<compile_context>
chip_gen: v7x
topology: tpu7x:2x2x1
jax: 0.10.0
libtpu: 0.0.40
codegen_flags: <defaults>
</compile_context>

<pallas_src>
import functools

import jax
import jax.numpy as jnp
from jax import lax
from jax.experimental import pallas as pl
from jax.experimental.pallas import tpu as pltpu


_LANE = 128
# Above v5e's 16 MiB default scoped VMEM, equal to v6e/v7x defaults, well under
# v7x's 64 MiB physical.
_VMEM_LIMIT_BYTES = 32 * 1024 * 1024


def _round_up(n, m):
    return int(pl.cdiv(n, m)) * m


# ---------------------------------------------------------------------------
# Pallas kernels
# ---------------------------------------------------------------------------
def _make_level_kernel(K, c1, c_real, mm_dtype):
    """Fused kernel for one flow level: K x (folded actnorm+invconv matmul +
    conditional affine coupling), row tile resident throughout.

    Block views (Cp = lane-padded channels, Hdp = lane-padded hidden):
      x_ref    : (TR, Cp)        input rows, f32 (pad lanes are zero)
      cond_ref : (TR, n_cond)    conditional rows, bf16
      wmix_ref : (K, Cp, Cp)     folded actnorm+invconv weights, f32
      bmix_ref : (K, 1, Cp)      folded biases, f32
      w1x_ref  : (K, Cp, Hdp)    coupling layer-1 folded onto x, bf16
      w1c_ref  : (n_cond, K*Hdp) coupling layer-1 cond weights (all steps), bf16
      b1_ref   : (K, 1, Hdp)     folded layer-1 bias, f32
      w2ab_ref : (K, Hdp, 2*Cp)  merged shift|scale heads, bf16
      b2ab_ref : (K, 1, 2*Cp)    merged head biases, f32
      z_ref    : (TR, Cp)        output rows, f32
      ld_ref   : (1, 1, Cp)      per-tile coupling-logdet partial, f32
    """

    def kernel(x_ref, cond_ref, wmix_ref, bmix_ref, w1x_ref, w1c_ref, b1_ref,
               w2ab_ref, b2ab_ref, z_ref, ld_ref):
        TR, Cp = x_ref.shape
        Hdp = w1x_ref.shape[2]

        x0 = x_ref[...]                               # (TR, Cp) f32
        cond = cond_ref[...]                          # (TR, n_cond) bf16
        # Conditional matmul hoisted out of the step loop: one wide-N MXU pass.
        cond_h = jnp.dot(cond, w1c_ref[...],
                         preferred_element_type=jnp.float32)  # (TR, K*Hdp)

        col = lax.broadcasted_iota(jnp.int32, (TR, Cp), 1)
        # z2 half of the REAL channels (pad lanes and z1 lanes pass through).
        upper = (col >= c1) & (col < c_real)

        def step(k, x, ld, cond_h_k):
            # folded actnorm + invertible 1x1 conv (f32 for flow fidelity)
            z = jnp.dot(x, wmix_ref[k],
                        preferred_element_type=jnp.float32) + bmix_ref[k]
            # coupling layer 1, folded onto x (no serial dependence on z)
            h = (jnp.dot(x.astype(mm_dtype), w1x_ref[k],
                         preferred_element_type=jnp.float32)
                 + cond_h_k + b1_ref[k])
            h = jnp.maximum(h, 0.0).astype(mm_dtype)
            # merged shift / scale heads: one matmul, lane-aligned halves
            st = jnp.dot(h, w2ab_ref[k],
                         preferred_element_type=jnp.float32) + b2ab_ref[k]
            shift = st[:, :Cp]
            t = st[:, Cp:] + 2.0
            # sigmoid / log-sigmoid sharing one exp (EUP-light):
            #   log s = min(t,0) - log1p(e),  s = where(t>=0,1,e) / (1+e)
            e = jnp.exp(-jnp.abs(t))
            # accurate log1p for e in (0,1] without relying on a log1p lowering
            log1p_e = jnp.where(e < 1e-4, e * (1.0 - 0.5 * e),
                                jnp.log(1.0 + e))
            log_s = jnp.where(upper, jnp.minimum(t, 0.0) - log1p_e, 0.0)
            scale = jnp.where(
                upper,
                jnp.where(t >= 0.0, 1.0, e)
                * pl.reciprocal(1.0 + e, approx=True),
                1.0)
            # z1 lanes and pad lanes: shift == 0, scale == 1 -> exact pass-through
            x_new = (z + shift) * scale
            ld_new = ld + jnp.sum(log_s, axis=0, keepdims=True)
            return x_new, ld_new

        ld0 = jnp.zeros((1, Cp), jnp.float32)
        if K <= 4:
            x, ld = x0, ld0
            for k in range(K):                        # small K: unrolled
                x, ld = step(k, x, ld, cond_h[:, k * Hdp:(k + 1) * Hdp])
        else:
            # large K: bound vreg live ranges / code size with a real loop
            def body(k, carry):
                xk, ldk = carry
                off = pl.multiple_of(k * Hdp, _LANE)
                cond_h_k = lax.dynamic_slice_in_dim(cond_h, off, Hdp, axis=1)
                return step(k, xk, ldk, cond_h_k)
            x, ld = lax.fori_loop(0, K, body, (x0, ld0))

        z_ref[...] = x
        ld_ref[0] = ld

    return kernel


def _matmul_bias_kernel(x_ref, w_ref, b_ref, o_ref):
    """o = x @ W + b  (only used for levels with no affine coupling steps)."""
    o_ref[...] = (jnp.dot(x_ref[...], w_ref[...],
                          preferred_element_type=jnp.float32) + b_ref[...])


# ---------------------------------------------------------------------------
# Kernel wrappers
# ---------------------------------------------------------------------------
def _vmem_full():
    """Whole-array operand resident in VMEM (single copy, never re-fetched /
    double-buffered across grid steps) — the Buffered(1) equivalent for
    constant weights."""
    return pl.BlockSpec(memory_space=pltpu.MemorySpace.VMEM)


def _pick_row_tile(rows_per_batch, batch, target):
    """Largest row tile <= target that (a) divides the per-batch row count so
    tiles never straddle batch boundaries (keeps the per-tile logdet partial
    attributable to one batch element), (b) is a multiple of 8 sublanes, and
    (c) leaves >= 2 grid steps when possible (keeps both v7x TensorCores busy).
    """
    total = rows_per_batch * batch
    cap = min(target, total // 2 if total >= 16 else total)
    cap = max(cap, 8)
    best = None
    t = 8
    lim = min(rows_per_batch, cap)
    while t <= lim:
        if rows_per_batch % t == 0:
            best = t
        t += 8
    if best is not None:
        return best
    if batch == 1:
        return rows_per_batch        # full-extent block is always legal
    raise ValueError(
        f"rows_per_batch={rows_per_batch} has no multiple-of-8 divisor; "
        "cannot tile without straddling batch boundaries")


def fused_level(rows_p, cond_rows, wmix, bmix, w1x, b1, w1c_all, w2ab, b2ab,
                *, c_real, c1, hw_per_batch, batch, mm_dtype):
    """One pallas_call covering all K affine FlowSteps of a level."""
    R, Cp = rows_p.shape
    K = wmix.shape[0]
    n_cond = cond_rows.shape[1]

    # Row-tile target derived from the VMEM budget: double-buffered in/cond/out
    # streams must sit well under the scoped limit (weights are tiny & single
    # buffered).
    bytes_per_row = 2 * (Cp * 4) + 2 * (n_cond * 2) + 2 * (Cp * 4)
    row_target = max(64, min(512, (_VMEM_LIMIT_BYTES // 4) // max(bytes_per_row, 1)))
    TR = _pick_row_tile(hw_per_batch, batch, row_target)
    T = R // TR

    rows_out, ld = pl.pallas_call(
        _make_level_kernel(K, c1, c_real, mm_dtype),
        out_shape=(jax.ShapeDtypeStruct((R, Cp), jnp.float32),
                   jax.ShapeDtypeStruct((T, 1, Cp), jnp.float32)),
        grid=(T,),
        in_specs=[
            pl.BlockSpec((TR, Cp), lambda t: (t, 0)),       # rows (f32)
            pl.BlockSpec((TR, n_cond), lambda t: (t, 0)),   # cond rows (bf16)
            _vmem_full(),   # wmix   (K, Cp, Cp)   f32
            _vmem_full(),   # bmix   (K, 1, Cp)    f32
            _vmem_full(),   # w1x    (K, Cp, Hdp)  bf16
            _vmem_full(),   # w1c    (n_cond, K*Hdp) bf16
            _vmem_full(),   # b1     (K, 1, Hdp)   f32
            _vmem_full(),   # w2ab   (K, Hdp, 2Cp) bf16
            _vmem_full(),   # b2ab   (K, 1, 2Cp)   f32
        ],
        out_specs=(
            pl.BlockSpec((TR, Cp), lambda t: (t, 0)),
            pl.BlockSpec((1, 1, Cp), lambda t: (t, 0, 0)),
        ),
        compiler_params=pltpu.CompilerParams(
            dimension_semantics=("parallel",),
            vmem_limit_bytes=_VMEM_LIMIT_BYTES),
    )(rows_p, cond_rows,
      wmix, bmix,
      w1x.astype(mm_dtype), w1c_all.astype(mm_dtype), b1,
      w2ab.astype(mm_dtype), b2ab)
    return rows_out, ld, TR


def fused_matmul_bias(rows_p, w_p, b_p, *, hw_per_batch, batch):
    """Composed no-coupling FlowSteps as a single matmul (K == 0 levels only)."""
    R, Cp = rows_p.shape
    TR = _pick_row_tile(hw_per_batch, batch, 512)
    T = R // TR
    return pl.pallas_call(
        _matmul_bias_kernel,
        out_shape=jax.ShapeDtypeStruct((R, Cp), jnp.float32),
        grid=(T,),
        in_specs=[pl.BlockSpec((TR, Cp), lambda t: (t, 0)),
                  _vmem_full(), _vmem_full()],
        out_specs=pl.BlockSpec((TR, Cp), lambda t: (t, 0)),
        compiler_params=pltpu.CompilerParams(
            dimension_semantics=("parallel",),
            vmem_limit_bytes=_VMEM_LIMIT_BYTES),
    )(rows_p, w_p, b_p)


# ---------------------------------------------------------------------------
# Glue: rows layout, actnorm/invconv folding, flow graph
# ---------------------------------------------------------------------------
def squeeze2x_nhwc(x):
    """flow.SqueezeLayer(factor=2) on NHWC with channel ordering matching the
    NCHW reference (new channel index = c*4 + sh*2 + sw)."""
    B, H, W, C = x.shape
    x = x.reshape(B, H // 2, 2, W // 2, 2, C)
    x = jnp.transpose(x, (0, 1, 3, 5, 2, 4))           # (B, H/2, W/2, C, 2, 2)
    return x.reshape(B, H // 2, W // 2, 4 * C)


def _fold_actnorm_invconv(p):
    """((x + bias) * exp(logs)) @ W  ==  x @ W' + b'  with
       W' = diag(exp(logs)) @ W,  b' = (bias * exp(logs)) @ W.
    Also returns the per-pixel logdet: sum(logs) + log|det W|."""
    s = jnp.exp(p['logs'])                              # (1, C)
    w_eff = s.reshape(-1, 1) * p['w']
    b_eff = (p['bias'] * s) @ p['w']
    ld_pp = jnp.sum(p['logs']) + jnp.linalg.slogdet(p['w'])[1]
    return w_eff, b_eff, ld_pp


def _compose_affine(first, second):
    """(x @ W1 + b1) @ W2 + b2  ==  x @ (W1 W2) + (b1 W2 + b2)."""
    w1, b1 = first
    w2, b2 = second
    return w1 @ w2, b1 @ w2 + b2


def flow_upsampler_encode(gt, rrdb_results, params, cfg, logdet0=0.0,
                          use_bf16_matmul=True):
    """Forward (reverse=False) path of FlowUpsamplerNet: gt -> (z, logdet)."""
    B = gt.shape[0]
    mm_dtype = jnp.bfloat16 if use_bf16_matmul else jnp.float32

    # single NCHW -> NHWC transpose; everything below stays in rows layout
    fl = jnp.transpose(gt, (0, 2, 3, 1)).astype(jnp.float32)
    if cfg.get('sigmoid_output', False):
        fl = jnp.log(jnp.clip(fl / (1.0 - fl), 1.0 / 1000, 1000.0))

    logdet = jnp.full((B,), logdet0, jnp.float32)
    level_to_name = {1: 'fea_up2', 2: 'fea_up1', 3: 'fea_up0'}

    for level in range(1, cfg['L'] + 1):
        fl = squeeze2x_nhwc(fl)
        _, Hc, Wc, C = fl.shape
        HW = Hc * Wc
        lvl = params['levels'][level - 1]
        K = len(lvl['steps'])
        Cp = _round_up(C, _LANE)

        # Fold actnorm into the invconv weight for every step; the actnorm /
        # invconv logdet is data independent: pixels * (sum(logs) + log|det W|).
        add_folds = [_fold_actnorm_invconv(p) for p in lvl['additional']]
        step_folds = [_fold_actnorm_invconv(p) for p in lvl['steps']]
        ld_const = sum((f[2] for f in add_folds + step_folds), 0.0)
        logdet = logdet + HW * ld_const

        # collapse (B, H, W) into one row axis; lane-pad channels to Cp
        rows = fl.reshape(B * HW, C)
        rows_p = jnp.pad(rows, ((0, 0), (0, Cp - C)))

        # compose the additionalFlowNoAffine steps into one affine
        add_comp = None
        if add_folds:
            w_c, b_c = add_folds[0][0], add_folds[0][1]
            for g in add_folds[1:]:
                w_c, b_c = _compose_affine((w_c, b_c), (g[0], g[1]))
            add_comp = (w_c, b_c)

        if K == 0:
            if add_comp is not None:
                w_p = jnp.pad(add_comp[0], ((0, Cp - C), (0, Cp - C)))
                b_p = jnp.pad(add_comp[1], ((0, 0), (0, Cp - C)))
                rows_p = fused_matmul_bias(rows_p, w_p, b_p,
                                           hw_per_batch=HW, batch=B)
            rows = rows_p[:, :C]
        else:
            cond = (rrdb_results[level_to_name[level]]
                    if rrdb_results is not None else None)
            assert cond is not None, "conditional rrdb features are required"
            cond_rows = jnp.transpose(cond, (0, 2, 3, 1)).reshape(B * HW, -1)
            cond_rows = cond_rows.astype(mm_dtype)      # bf16 DMA stream
            n_cond = cond_rows.shape[1]

            C1 = C // 2
            C2 = C - C1
            Hd = lvl['steps'][0]['coupling']['w1'].shape[1]
            Hdp = _round_up(Hd, _LANE)

            wmix_l, bmix_l, w1x_l, b1_l, w1c_l, w2ab_l, b2ab_l = ([] for _ in range(7))
            for k, f in enumerate(step_folds):
                w_mix, b_mix = f[0], f[1]
                if k == 0 and add_comp is not None:
                    # fold the additional no-coupling steps into step 0's mix
                    w_mix, b_mix = _compose_affine(add_comp, (w_mix, b_mix))
                p = lvl['steps'][k]['coupling']
                cw1, cb1, cw2, cb2 = p['w1'], p['b1'], p['w2'], p['b2']
                w1z = cw1[:C1]                         # (C1, Hd)
                w1c = cw1[C1:]                         # (n_cond, Hd)
                # fold z1 = x @ w_mix[:, :C1] + b_mix[:, :C1] into layer 1
                w1x = w_mix[:, :C1] @ w1z              # (C, Hd)
                b1f = cb1 + b_mix[:, :C1] @ w1z        # (1, Hd)
                # lane-padded frames
                wmix_l.append(jnp.pad(w_mix, ((0, Cp - C), (0, Cp - C))))
                bmix_l.append(jnp.pad(b_mix, ((0, 0), (0, Cp - C))))
                w1x_l.append(jnp.pad(w1x, ((0, Cp - C), (0, Hdp - Hd))))
                b1_l.append(jnp.pad(b1f, ((0, 0), (0, Hdp - Hd))))
                w1c_l.append(jnp.pad(w1c, ((0, 0), (0, Hdp - Hd))))
                # shift / scale heads placed on the z2 lanes [C1, C), merged
                w2a = jnp.zeros((Hdp, Cp), jnp.float32).at[:Hd, C1:C].set(cw2[:, :C2])
                w2b = jnp.zeros((Hdp, Cp), jnp.float32).at[:Hd, C1:C].set(cw2[:, C2:])
                b2a = jnp.zeros((1, Cp), jnp.float32).at[:, C1:C].set(cb2[:, :C2])
                b2b = jnp.zeros((1, Cp), jnp.float32).at[:, C1:C].set(cb2[:, C2:])
                w2ab_l.append(jnp.concatenate([w2a, w2b], axis=1))   # (Hdp, 2Cp)
                b2ab_l.append(jnp.concatenate([b2a, b2b], axis=1))   # (1, 2Cp)

            wmix = jnp.stack(wmix_l)                   # (K, Cp, Cp) f32
            bmix = jnp.stack(bmix_l)                   # (K, 1, Cp)
            w1x = jnp.stack(w1x_l)                     # (K, Cp, Hdp)
            b1 = jnp.stack(b1_l)                       # (K, 1, Hdp)
            w1c_all = jnp.concatenate(w1c_l, axis=1)   # (n_cond, K*Hdp)
            w2ab = jnp.stack(w2ab_l)                   # (K, Hdp, 2Cp)
            b2ab = jnp.stack(b2ab_l)                   # (K, 1, 2Cp)

            rows_p, ld_part, TR = fused_level(
                rows_p, cond_rows, wmix, bmix, w1x, b1, w1c_all, w2ab, b2ab,
                c_real=C, c1=C1, hw_per_batch=HW, batch=B, mm_dtype=mm_dtype)

            # tiles are batch-major and never straddle batches -> group per batch
            logdet = logdet + ld_part.reshape(B, -1).sum(axis=1)
            rows = rows_p[:, :C]

        fl = rows.reshape(B, Hc, Wc, C)
        # TODO(synk): Split2d (network_G.flow.split) omitted in this synthetic config.

    z = jnp.transpose(fl, (0, 3, 1, 2))                 # back to NCHW once
    return z, logdet


# ---------------------------------------------------------------------------
# Deterministic parameter construction
# ---------------------------------------------------------------------------
def build_params(key, cfg):
    C = cfg['C_in']
    n_cond = cfg['n_rrdb']
    hidden = cfg['hidden']
    levels = []
    for level in range(1, cfg['L'] + 1):
        C = C * 4  # after squeeze

        def make_step(k, with_coupling):
            ks = jax.random.split(k, 8)
            bias = (0.01 * jax.random.normal(ks[0], (1, C))).astype(jnp.float32)
            logs = (0.01 * jax.random.normal(ks[1], (1, C))).astype(jnp.float32)
            w = (jnp.eye(C) + 0.05 * jax.random.normal(ks[2], (C, C))).astype(jnp.float32)
            coupling = None
            if with_coupling:
                C1 = C // 2
                C2 = C - C1
                cin = C1 + n_cond
                coupling = {
                    'w1': (0.05 * jax.random.normal(ks[3], (cin, hidden))).astype(jnp.float32),
                    'b1': jnp.zeros((1, hidden), jnp.float32),
                    'w2': (0.05 * jax.random.normal(ks[4], (hidden, 2 * C2))).astype(jnp.float32),
                    'b2': jnp.zeros((1, 2 * C2), jnp.float32),
                }
            return {'bias': bias, 'logs': logs, 'w': w, 'coupling': coupling}

        key, *subs = jax.random.split(key, 1 + cfg['n_additional'] + cfg['K'])
        additional = [make_step(subs[i], False) for i in range(cfg['n_additional'])]
        steps = [make_step(subs[cfg['n_additional'] + i], True) for i in range(cfg['K'])]
        levels.append({'additional': additional, 'steps': steps})
    return {'levels': levels}, C


# ---------------------------------------------------------------------------
if __name__ == "__main__":
    cfg = {
        'L': 2,             # network_G.flow.L
        'K': 1,             # network_G.flow.K (per level)
        'n_additional': 1,  # network_G.flow.additionalFlowNoAffine
        'C_in': 3,          # image_shape = (16, 16, 3)
        'GT_size': 16,      # opt.datasets.train.GT_size
        'n_rrdb': 64,       # conditional (stackRRDB) channels per level
        'hidden': 64,       # coupling hidden width (synthetic; SRFlow uses 288 + 3x3 convs)
        'sigmoid_output': False,
    }
    B, H, W = 2, 16, 16

    key = jax.random.PRNGKey(0)
    k_gt, k_c1, k_c2, k_params = jax.random.split(key, 4)

    gt = jax.random.uniform(k_gt, (B, cfg['C_in'], H, W), jnp.float32)
    # rrdbResults conditional features at each level's (post-squeeze) resolution.
    rrdb_results = {
        'fea_up2': 0.1 * jax.random.normal(k_c1, (B, cfg['n_rrdb'], H // 2, W // 2), jnp.float32),
        'fea_up1': 0.1 * jax.random.normal(k_c2, (B, cfg['n_rrdb'], H // 4, W // 4), jnp.float32),
    }

    params, C_out = build_params(k_params, cfg)

    encode = jax.jit(functools.partial(flow_upsampler_encode, cfg=cfg))
    z, logdet = encode(gt, rrdb_results, params)
    z = jax.block_until_ready(z)
    logdet = jax.block_until_ready(logdet)

    expected = (B, cfg['C_in'] * (4 ** cfg['L']), H // (2 ** cfg['L']), W // (2 ** cfg['L']))
    assert z.shape == expected, (z.shape, expected)
    assert logdet.shape == (B,)
    assert bool(jnp.all(jnp.isfinite(z))) and bool(jnp.all(jnp.isfinite(logdet)))
    print("KERNEL_OK")
</pallas_src>

<mosaic_0001>
module attributes {stable_mosaic.version = 11 : i64} {
  func.func @kernel(%arg0: i32, %arg1: memref<64x128xf32, #tpu.memory_space<vmem>>, %arg2: memref<64x64xbf16, #tpu.memory_space<vmem>>, %arg3: memref<1x128x128xf32, #tpu.memory_space<vmem>>, %arg4: memref<1x1x128xf32, #tpu.memory_space<vmem>>, %arg5: memref<1x128x128xbf16, #tpu.memory_space<vmem>>, %arg6: memref<64x128xbf16, #tpu.memory_space<vmem>>, %arg7: memref<1x1x128xf32, #tpu.memory_space<vmem>>, %arg8: memref<1x128x256xbf16, #tpu.memory_space<vmem>>, %arg9: memref<1x1x256xf32, #tpu.memory_space<vmem>>, %arg10: memref<64x128xf32, #tpu.memory_space<vmem>>, %arg11: memref<1x1x128xf32, #tpu.memory_space<vmem>>) attributes {dimension_semantics = [#tpu.dimension_semantics<parallel>], iteration_bounds = array<i64: 2>, scalar_prefetch = 0 : i64, scratch_operands = 0 : i64, tpu.core_type = #tpu.core_type<tc>, window_params = [{transform_indices = @transform_0, window_bounds = array<i64: 64, 128>}, {transform_indices = @transform_1, window_bounds = array<i64: 64, 64>}, {pipeline_mode = #tpu.pipeline_mode<synchronous>, transform_indices = @transform_2, window_bounds = array<i64: 1, 128, 128>}, {pipeline_mode = #tpu.pipeline_mode<synchronous>, transform_indices = @transform_3, window_bounds = array<i64: 1, 1, 128>}, {pipeline_mode = #tpu.pipeline_mode<synchronous>, transform_indices = @transform_4, window_bounds = array<i64: 1, 128, 128>}, {pipeline_mode = #tpu.pipeline_mode<synchronous>, transform_indices = @transform_5, window_bounds = array<i64: 64, 128>}, {pipeline_mode = #tpu.pipeline_mode<synchronous>, transform_indices = @transform_6, window_bounds = array<i64: 1, 1, 128>}, {pipeline_mode = #tpu.pipeline_mode<synchronous>, transform_indices = @transform_7, window_bounds = array<i64: 1, 128, 256>}, {pipeline_mode = #tpu.pipeline_mode<synchronous>, transform_indices = @transform_8, window_bounds = array<i64: 1, 1, 256>}, {transform_indices = @transform_9, window_bounds = array<i64: 64, 128>}, {transform_indices = @transform_10, window_bounds = array<i64: 1, 1, 128>}]} {
    %c0 = arith.constant 0 : index
    %c0_0 = arith.constant 0 : index
    %0 = vector.load %arg1[%c0, %c0_0] : memref<64x128xf32, #tpu.memory_space<vmem>>, vector<64x128xf32>
    %c0_1 = arith.constant 0 : index
    %c0_2 = arith.constant 0 : index
    %1 = vector.load %arg2[%c0_1, %c0_2] : memref<64x64xbf16, #tpu.memory_space<vmem>>, vector<64x64xbf16>
    %c0_3 = arith.constant 0 : index
    %c0_4 = arith.constant 0 : index
    %2 = vector.load %arg6[%c0_3, %c0_4] : memref<64x128xbf16, #tpu.memory_space<vmem>>, vector<64x128xbf16>
    %cst = arith.constant dense<0.000000e+00> : vector<64x128xf32>
    %3 = tpu.matmul %1, %2, %cst {dimension_numbers = #tpu.dot_dimension_numbers<[1], [0], [0], [1], [0, 0, 1, 1], [], []>} : vector<64x64xbf16>, vector<64x128xbf16>, vector<64x128xf32> -> vector<64x128xf32>
    %4 = tpu.iota {dimensions = array<i32: 1>} : vector<64x128xi32>
    %c6_i32 = arith.constant 6 : i32
    %5 = vector.broadcast %c6_i32 : i32 to vector<64x128xi32>
    %6 = arith.cmpi sge, %4, %5 : vector<64x128xi32>
    %c12_i32 = arith.constant 12 : i32
    %7 = vector.broadcast %c12_i32 : i32 to vector<64x128xi32>
    %8 = arith.cmpi slt, %4, %7 : vector<64x128xi32>
    %9 = arith.andi %6, %8 : vector<64x128xi1>
    %cst_5 = arith.constant 0.000000e+00 : f32
    %10 = vector.broadcast %cst_5 : f32 to vector<1x128xf32>
    %c0_6 = arith.constant 0 : index
    %c0_7 = arith.constant 0 : index
    %c0_8 = arith.constant 0 : index
    %11 = vector.load %arg3[%c0_6, %c0_7, %c0_8] : memref<1x128x128xf32, #tpu.memory_space<vmem>>, vector<1x128x128xf32>
    %12 = vector.shape_cast %11 : vector<1x128x128xf32> to vector<128x128xf32>
    %cst_9 = arith.constant dense<0.000000e+00> : vector<64x128xf32>
    %13 = tpu.matmul %0, %12, %cst_9 {dimension_numbers = #tpu.dot_dimension_numbers<[1], [0], [0], [1], [0, 0, 1, 1], [], []>} : vector<64x128xf32>, vector<128x128xf32>, vector<64x128xf32> -> vector<64x128xf32>
    %c0_10 = arith.constant 0 : index
    %c0_11 = arith.constant 0 : index
    %c0_12 = arith.constant 0 : index
    %14 = vector.load %arg4[%c0_10, %c0_11, %c0_12] : memref<1x1x128xf32, #tpu.memory_space<vmem>>, vector<1x1x128xf32>
    %15 = vector.shape_cast %14 : vector<1x1x128xf32> to vector<1x128xf32>
    %16 = vector.broadcast %15 : vector<1x128xf32> to vector<64x128xf32>
    %17 = arith.addf %13, %16 : vector<64x128xf32>
    %18 = arith.truncf %0 : vector<64x128xf32> to vector<64x128xbf16>
    %c0_13 = arith.constant 0 : index
    %c0_14 = arith.constant 0 : index
    %c0_15 = arith.constant 0 : index
    %19 = vector.load %arg5[%c0_13, %c0_14, %c0_15] : memref<1x128x128xbf16, #tpu.memory_space<vmem>>, vector<1x128x128xbf16>
    %20 = vector.shape_cast %19 : vector<1x128x128xbf16> to vector<128x128xbf16>
    %cst_16 = arith.constant dense<0.000000e+00> : vector<64x128xf32>
    %21 = tpu.matmul %18, %20, %cst_16 {dimension_numbers = #tpu.dot_dimension_numbers<[1], [0], [0], [1], [0, 0, 1, 1], [], []>} : vector<64x128xbf16>, vector<128x128xbf16>, vector<64x128xf32> -> vector<64x128xf32>
    %22 = arith.addf %21, %3 : vector<64x128xf32>
    %c0_17 = arith.constant 0 : index
    %c0_18 = arith.constant 0 : index
    %c0_19 = arith.constant 0 : index
    %23 = vector.load %arg7[%c0_17, %c0_18, %c0_19] : memref<1x1x128xf32, #tpu.memory_space<vmem>>, vector<1x1x128xf32>
    %24 = vector.shape_cast %23 : vector<1x1x128xf32> to vector<1x128xf32>
    %25 = vector.broadcast %24 : vector<1x128xf32> to vector<64x128xf32>
    %26 = arith.addf %22, %25 : vector<64x128xf32>
    %cst_20 = arith.constant 0.000000e+00 : f32
    %27 = vector.broadcast %cst_20 : f32 to vector<64x128xf32>
    %28 = arith.maximumf %26, %27 : vector<64x128xf32>
    %29 = arith.truncf %28 : vector<64x128xf32> to vector<64x128xbf16>
    %c0_21 = arith.constant 0 : index
    %c0_22 = arith.constant 0 : index
    %c0_23 = arith.constant 0 : index
    %30 = vector.load %arg8[%c0_21, %c0_22, %c0_23] : memref<1x128x256xbf16, #tpu.memory_space<vmem>>, vector<1x128x256xbf16>
    %31 = vector.shape_cast %30 : vector<1x128x256xbf16> to vector<128x256xbf16>
    %cst_24 = arith.constant dense<0.000000e+00> : vector<64x256xf32>
    %32 = tpu.matmul %29, %31, %cst_24 {dimension_numbers = #tpu.dot_dimension_numbers<[1], [0], [0], [1], [0, 0, 1, 1], [], []>} : vector<64x128xbf16>, vector<128x256xbf16>, vector<64x256xf32> -> vector<64x256xf32>
    %c0_25 = arith.constant 0 : index
    %c0_26 = arith.constant 0 : index
    %c0_27 = arith.constant 0 : index
    %33 = vector.load %arg9[%c0_25, %c0_26, %c0_27] : memref<1x1x256xf32, #tpu.memory_space<vmem>>, vector<1x1x256xf32>
    %34 = vector.shape_cast %33 : vector<1x1x256xf32> to vector<1x256xf32>
    %35 = vector.broadcast %34 : vector<1x256xf32> to vector<64x256xf32>
    %36 = arith.addf %32, %35 : vector<64x256xf32>
    %37 = vector.extract_strided_slice %36 {offsets = [0, 0], sizes = [64, 128], strides = [1, 1]} : vector<64x256xf32> to vector<64x128xf32>
    %38 = vector.extract_strided_slice %36 {offsets = [0, 128], sizes = [64, 128], strides = [1, 1]} : vector<64x256xf32> to vector<64x128xf32>
    %cst_28 = arith.constant 2.000000e+00 : f32
    %39 = vector.broadcast %cst_28 : f32 to vector<64x128xf32>
    %40 = arith.addf %38, %39 : vector<64x128xf32>
    %41 = math.absf %40 : vector<64x128xf32>
    %cst_29 = arith.constant 0.000000e+00 : f32
    %42 = vector.broadcast %cst_29 : f32 to vector<64x128xf32>
    %43 = arith.subf %42, %41 : vector<64x128xf32>
    %44 = math.exp %43 : vector<64x128xf32>
    %cst_30 = arith.constant 9.99999974E-5 : f32
    %45 = vector.broadcast %cst_30 : f32 to vector<64x128xf32>
    %46 = arith.cmpf olt, %44, %45 : vector<64x128xf32>
    %cst_31 = arith.constant 5.000000e-01 : f32
    %47 = vector.broadcast %cst_31 : f32 to vector<64x128xf32>
    %48 = arith.mulf %47, %44 : vector<64x128xf32>
    %cst_32 = arith.constant 1.000000e+00 : f32
    %49 = vector.broadcast %cst_32 : f32 to vector<64x128xf32>
    %50 = arith.subf %49, %48 : vector<64x128xf32>
    %51 = arith.mulf %44, %50 : vector<64x128xf32>
    %cst_33 = arith.constant 1.000000e+00 : f32
    %52 = vector.broadcast %cst_33 : f32 to vector<64x128xf32>
    %53 = arith.addf %52, %44 : vector<64x128xf32>
    %54 = math.log %53 : vector<64x128xf32>
    %55 = arith.select %46, %51, %54 : vector<64x128xi1>, vector<64x128xf32>
    %cst_34 = arith.constant 0.000000e+00 : f32
    %56 = vector.broadcast %cst_34 : f32 to vector<64x128xf32>
    %57 = arith.minimumf %40, %56 : vector<64x128xf32>
    %58 = arith.subf %57, %55 : vector<64x128xf32>
    %cst_35 = arith.constant 0.000000e+00 : f32
    %59 = vector.broadcast %cst_35 : f32 to vector<64x128xf32>
    %60 = arith.select %9, %58, %59 : vector<64x128xi1>, vector<64x128xf32>
    %cst_36 = arith.constant 0.000000e+00 : f32
    %61 = vector.broadcast %cst_36 : f32 to vector<64x128xf32>
    %62 = arith.cmpf oge, %40, %61 : vector<64x128xf32>
    %cst_37 = arith.constant 1.000000e+00 : f32
    %63 = vector.broadcast %cst_37 : f32 to vector<64x128xf32>
    %64 = arith.select %62, %63, %44 : vector<64x128xi1>, vector<64x128xf32>
    %cst_38 = arith.constant 1.000000e+00 : f32
    %65 = vector.broadcast %cst_38 : f32 to vector<64x128xf32>
    %66 = arith.addf %65, %44 : vector<64x128xf32>
    %67 = tpu.reciprocal %66 {approx = true} : vector<64x128xf32> -> vector<64x128xf32>
    %68 = arith.mulf %64, %67 : vector<64x128xf32>
    %cst_39 = arith.constant 1.000000e+00 : f32
    %69 = vector.broadcast %cst_39 : f32 to vector<64x128xf32>
    %70 = arith.select %9, %68, %69 : vector<64x128xi1>, vector<64x128xf32>
    %71 = arith.addf %17, %37 : vector<64x128xf32>
    %72 = arith.mulf %71, %70 : vector<64x128xf32>
    %cst_40 = arith.constant dense<0.000000e+00> : vector<128xf32>
    %73 = vector.multi_reduction <add>, %60, %cst_40 [0] : vector<64x128xf32> to vector<128xf32>
    %74 = vector.shape_cast %73 : vector<128xf32> to vector<1x128xf32>
    %75 = arith.addf %10, %74 : vector<1x128xf32>
    %c0_41 = arith.constant 0 : index
    %c0_42 = arith.constant 0 : index
    %76 = vector.load %arg10[%c0_41, %c0_42] : memref<64x128xf32, #tpu.memory_space<vmem>>, vector<64x128xf32>
    tpu.vector_store %arg10[%c0_41, %c0_42], %72 {strides = array<i32>} : memref<64x128xf32, #tpu.memory_space<vmem>>, vector<64x128xf32>,
    %c0_43 = arith.constant 0 : index
    %c0_44 = arith.constant 0 : index
    %c0_45 = arith.constant 0 : index
    %77 = vector.load %arg11[%c0_43, %c0_44, %c0_45] : memref<1x1x128xf32, #tpu.memory_space<vmem>>, vector<1x1x128xf32>
    %78 = vector.shape_cast %77 : vector<1x1x128xf32> to vector<1x128xf32>
    %79 = vector.shape_cast %75 : vector<1x128xf32> to vector<1x1x128xf32>
    tpu.vector_store %arg11[%c0_43, %c0_44, %c0_45], %79 {strides = array<i32>} : memref<1x1x128xf32, #tpu.memory_space<vmem>>, vector<1x1x128xf32>,
    return
  }
  func.func @transform_0(%arg0: i32) -> (i32, i32) {
    %c0_i32 = arith.constant 0 : i32
    %c0_i32_0 = arith.constant 0 : i32
    return %arg0, %c0_i32 : i32, i32
  }
  func.func @transform_1(%arg0: i32) -> (i32, i32) {
    %c0_i32 = arith.constant 0 : i32
    %c0_i32_0 = arith.constant 0 : i32
    return %arg0, %c0_i32 : i32, i32
  }
  func.func @transform_2(%arg0: i32) -> (i32, i32, i32) {
    %c0_i32 = arith.constant 0 : i32
    %c0_i32_0 = arith.constant 0 : i32
    %c0_i32_1 = arith.constant 0 : i32
    %c0_i32_2 = arith.constant 0 : i32
    return %c0_i32, %c0_i32_0, %c0_i32_1 : i32, i32, i32
  }
  func.func @transform_3(%arg0: i32) -> (i32, i32, i32) {
    %c0_i32 = arith.constant 0 : i32
    %c0_i32_0 = arith.constant 0 : i32
    %c0_i32_1 = arith.constant 0 : i32
    %c0_i32_2 = arith.constant 0 : i32
    return %c0_i32, %c0_i32_0, %c0_i32_1 : i32, i32, i32
  }
  func.func @transform_4(%arg0: i32) -> (i32, i32, i32) {
    %c0_i32 = arith.constant 0 : i32
    %c0_i32_0 = arith.constant 0 : i32
    %c0_i32_1 = arith.constant 0 : i32
    %c0_i32_2 = arith.constant 0 : i32
    return %c0_i32, %c0_i32_0, %c0_i32_1 : i32, i32, i32
  }
  func.func @transform_5(%arg0: i32) -> (i32, i32) {
    %c0_i32 = arith.constant 0 : i32
    %c0_i32_0 = arith.constant 0 : i32
    %c0_i32_1 = arith.constant 0 : i32
    return %c0_i32, %c0_i32_0 : i32, i32
  }
  func.func @transform_6(%arg0: i32) -> (i32, i32, i32) {
    %c0_i32 = arith.constant 0 : i32
    %c0_i32_0 = arith.constant 0 : i32
    %c0_i32_1 = arith.constant 0 : i32
    %c0_i32_2 = arith.constant 0 : i32
    return %c0_i32, %c0_i32_0, %c0_i32_1 : i32, i32, i32
  }
  func.func @transform_7(%arg0: i32) -> (i32, i32, i32) {
    %c0_i32 = arith.constant 0 : i32
    %c0_i32_0 = arith.constant 0 : i32
    %c0_i32_1 = arith.constant 0 : i32
    %c0_i32_2 = arith.constant 0 : i32
    return %c0_i32, %c0_i32_0, %c0_i32_1 : i32, i32, i32
  }
  func.func @transform_8(%arg0: i32) -> (i32, i32, i32) {
    %c0_i32 = arith.constant 0 : i32
    %c0_i32_0 = arith.constant 0 : i32
    %c0_i32_1 = arith.constant 0 : i32
    %c0_i32_2 = arith.constant 0 : i32
    return %c0_i32, %c0_i32_0, %c0_i32_1 : i32, i32, i32
  }
  func.func @transform_9(%arg0: i32) -> (i32, i32) {
    %c0_i32 = arith.constant 0 : i32
    %c0_i32_0 = arith.constant 0 : i32
    return %arg0, %c0_i32 : i32, i32
  }
  func.func @transform_10(%arg0: i32) -> (i32, i32, i32) {
    %c0_i32 = arith.constant 0 : i32
    %c0_i32_0 = arith.constant 0 : i32
    %c0_i32_1 = arith.constant 0 : i32
    return %arg0, %c0_i32, %c0_i32_0 : i32, i32, i32
  }
}

module attributes {stable_mosaic.version = 11 : i64} {
  func.func @kernel(%arg0: i32, %arg1: memref<16x128xf32, #tpu.memory_space<vmem>>, %arg2: memref<16x64xbf16, #tpu.memory_space<vmem>>, %arg3: memref<1x128x128xf32, #tpu.memory_space<vmem>>, %arg4: memref<1x1x128xf32, #tpu.memory_space<vmem>>, %arg5: memref<1x128x128xbf16, #tpu.memory_space<vmem>>, %arg6: memref<64x128xbf16, #tpu.memory_space<vmem>>, %arg7: memref<1x1x128xf32, #tpu.memory_space<vmem>>, %arg8: memref<1x128x256xbf16, #tpu.memory_space<vmem>>, %arg9: memref<1x1x256xf32, #tpu.memory_space<vmem>>, %arg10: memref<16x128xf32, #tpu.memory_space<vmem>>, %arg11: memref<1x1x128xf32, #tpu.memory_space<vmem>>) attributes {dimension_semantics = [#tpu.dimension_semantics<parallel>], iteration_bounds = array<i64: 2>, scalar_prefetch = 0 : i64, scratch_operands = 0 : i64, tpu.core_type = #tpu.core_type<tc>, window_params = [{transform_indices = @transform_0, window_bounds = array<i64: 16, 128>}, {transform_indices = @transform_1, window_bounds = array<i64: 16, 64>}, {pipeline_mode = #tpu.pipeline_mode<synchronous>, transform_indices = @transform_2, window_bounds = array<i64: 1, 128, 128>}, {pipeline_mode = #tpu.pipeline_mode<synchronous>, transform_indices = @transform_3, window_bounds = array<i64: 1, 1, 128>}, {pipeline_mode = #tpu.pipeline_mode<synchronous>, transform_indices = @transform_4, window_bounds = array<i64: 1, 128, 128>}, {pipeline_mode = #tpu.pipeline_mode<synchronous>, transform_indices = @transform_5, window_bounds = array<i64: 64, 128>}, {pipeline_mode = #tpu.pipeline_mode<synchronous>, transform_indices = @transform_6, window_bounds = array<i64: 1, 1, 128>}, {pipeline_mode = #tpu.pipeline_mode<synchronous>, transform_indices = @transform_7, window_bounds = array<i64: 1, 128, 256>}, {pipeline_mode = #tpu.pipeline_mode<synchronous>, transform_indices = @transform_8, window_bounds = array<i64: 1, 1, 256>}, {transform_indices = @transform_9, window_bounds = array<i64: 16, 128>}, {transform_indices = @transform_10, window_bounds = array<i64: 1, 1, 128>}]} {
    %c0 = arith.constant 0 : index
    %c0_0 = arith.constant 0 : index
    %0 = vector.load %arg1[%c0, %c0_0] : memref<16x128xf32, #tpu.memory_space<vmem>>, vector<16x128xf32>
    %c0_1 = arith.constant 0 : index
    %c0_2 = arith.constant 0 : index
    %1 = vector.load %arg2[%c0_1, %c0_2] : memref<16x64xbf16, #tpu.memory_space<vmem>>, vector<16x64xbf16>
    %c0_3 = arith.constant 0 : index
    %c0_4 = arith.constant 0 : index
    %2 = vector.load %arg6[%c0_3, %c0_4] : memref<64x128xbf16, #tpu.memory_space<vmem>>, vector<64x128xbf16>
    %cst = arith.constant dense<0.000000e+00> : vector<16x128xf32>
    %3 = tpu.matmul %1, %2, %cst {dimension_numbers = #tpu.dot_dimension_numbers<[1], [0], [0], [1], [0, 0, 1, 1], [], []>} : vector<16x64xbf16>, vector<64x128xbf16>, vector<16x128xf32> -> vector<16x128xf32>
    %4 = tpu.iota {dimensions = array<i32: 1>} : vector<16x128xi32>
    %c24_i32 = arith.constant 24 : i32
    %5 = vector.broadcast %c24_i32 : i32 to vector<16x128xi32>
    %6 = arith.cmpi sge, %4, %5 : vector<16x128xi32>
    %c48_i32 = arith.constant 48 : i32
    %7 = vector.broadcast %c48_i32 : i32 to vector<16x128xi32>
    %8 = arith.cmpi slt, %4, %7 : vector<16x128xi32>
    %9 = arith.andi %6, %8 : vector<16x128xi1>
    %cst_5 = arith.constant 0.000000e+00 : f32
    %10 = vector.broadcast %cst_5 : f32 to vector<1x128xf32>
    %c0_6 = arith.constant 0 : index
    %c0_7 = arith.constant 0 : index
    %c0_8 = arith.constant 0 : index
    %11 = vector.load %arg3[%c0_6, %c0_7, %c0_8] : memref<1x128x128xf32, #tpu.memory_space<vmem>>, vector<1x128x128xf32>
    %12 = vector.shape_cast %11 : vector<1x128x128xf32> to vector<128x128xf32>
    %cst_9 = arith.constant dense<0.000000e+00> : vector<16x128xf32>
    %13 = tpu.matmul %0, %12, %cst_9 {dimension_numbers = #tpu.dot_dimension_numbers<[1], [0], [0], [1], [0, 0, 1, 1], [], []>} : vector<16x128xf32>, vector<128x128xf32>, vector<16x128xf32> -> vector<16x128xf32>
    %c0_10 = arith.constant 0 : index
    %c0_11 = arith.constant 0 : index
    %c0_12 = arith.constant 0 : index
    %14 = vector.load %arg4[%c0_10, %c0_11, %c0_12] : memref<1x1x128xf32, #tpu.memory_space<vmem>>, vector<1x1x128xf32>
    %15 = vector.shape_cast %14 : vector<1x1x128xf32> to vector<1x128xf32>
    %16 = vector.broadcast %15 : vector<1x128xf32> to vector<16x128xf32>
    %17 = arith.addf %13, %16 : vector<16x128xf32>
    %18 = arith.truncf %0 : vector<16x128xf32> to vector<16x128xbf16>
    %c0_13 = arith.constant 0 : index
    %c0_14 = arith.constant 0 : index
    %c0_15 = arith.constant 0 : index
    %19 = vector.load %arg5[%c0_13, %c0_14, %c0_15] : memref<1x128x128xbf16, #tpu.memory_space<vmem>>, vector<1x128x128xbf16>
    %20 = vector.shape_cast %19 : vector<1x128x128xbf16> to vector<128x128xbf16>
    %cst_16 = arith.constant dense<0.000000e+00> : vector<16x128xf32>
    %21 = tpu.matmul %18, %20, %cst_16 {dimension_numbers = #tpu.dot_dimension_numbers<[1], [0], [0], [1], [0, 0, 1, 1], [], []>} : vector<16x128xbf16>, vector<128x128xbf16>, vector<16x128xf32> -> vector<16x128xf32>
    %22 = arith.addf %21, %3 : vector<16x128xf32>
    %c0_17 = arith.constant 0 : index
    %c0_18 = arith.constant 0 : index
    %c0_19 = arith.constant 0 : index
    %23 = vector.load %arg7[%c0_17, %c0_18, %c0_19] : memref<1x1x128xf32, #tpu.memory_space<vmem>>, vector<1x1x128xf32>
    %24 = vector.shape_cast %23 : vector<1x1x128xf32> to vector<1x128xf32>
    %25 = vector.broadcast %24 : vector<1x128xf32> to vector<16x128xf32>
    %26 = arith.addf %22, %25 : vector<16x128xf32>
    %cst_20 = arith.constant 0.000000e+00 : f32
    %27 = vector.broadcast %cst_20 : f32 to vector<16x128xf32>
    %28 = arith.maximumf %26, %27 : vector<16x128xf32>
    %29 = arith.truncf %28 : vector<16x128xf32> to vector<16x128xbf16>
    %c0_21 = arith.constant 0 : index
    %c0_22 = arith.constant 0 : index
    %c0_23 = arith.constant 0 : index
    %30 = vector.load %arg8[%c0_21, %c0_22, %c0_23] : memref<1x128x256xbf16, #tpu.memory_space<vmem>>, vector<1x128x256xbf16>
    %31 = vector.shape_cast %30 : vector<1x128x256xbf16> to vector<128x256xbf16>
    %cst_24 = arith.constant dense<0.000000e+00> : vector<16x256xf32>
    %32 = tpu.matmul %29, %31, %cst_24 {dimension_numbers = #tpu.dot_dimension_numbers<[1], [0], [0], [1], [0, 0, 1, 1], [], []>} : vector<16x128xbf16>, vector<128x256xbf16>, vector<16x256xf32> -> vector<16x256xf32>
    %c0_25 = arith.constant 0 : index
    %c0_26 = arith.constant 0 : index
    %c0_27 = arith.constant 0 : index
    %33 = vector.load %arg9[%c0_25, %c0_26, %c0_27] : memref<1x1x256xf32, #tpu.memory_space<vmem>>, vector<1x1x256xf32>
    %34 = vector.shape_cast %33 : vector<1x1x256xf32> to vector<1x256xf32>
    %35 = vector.broadcast %34 : vector<1x256xf32> to vector<16x256xf32>
    %36 = arith.addf %32, %35 : vector<16x256xf32>
    %37 = vector.extract_strided_slice %36 {offsets = [0, 0], sizes = [16, 128], strides = [1, 1]} : vector<16x256xf32> to vector<16x128xf32>
    %38 = vector.extract_strided_slice %36 {offsets = [0, 128], sizes = [16, 128], strides = [1, 1]} : vector<16x256xf32> to vector<16x128xf32>
    %cst_28 = arith.constant 2.000000e+00 : f32
    %39 = vector.broadcast %cst_28 : f32 to vector<16x128xf32>
    %40 = arith.addf %38, %39 : vector<16x128xf32>
    %41 = math.absf %40 : vector<16x128xf32>
    %cst_29 = arith.constant 0.000000e+00 : f32
    %42 = vector.broadcast %cst_29 : f32 to vector<16x128xf32>
    %43 = arith.subf %42, %41 : vector<16x128xf32>
    %44 = math.exp %43 : vector<16x128xf32>
    %cst_30 = arith.constant 9.99999974E-5 : f32
    %45 = vector.broadcast %cst_30 : f32 to vector<16x128xf32>
    %46 = arith.cmpf olt, %44, %45 : vector<16x128xf32>
    %cst_31 = arith.constant 5.000000e-01 : f32
    %47 = vector.broadcast %cst_31 : f32 to vector<16x128xf32>
    %48 = arith.mulf %47, %44 : vector<16x128xf32>
    %cst_32 = arith.constant 1.000000e+00 : f32
    %49 = vector.broadcast %cst_32 : f32 to vector<16x128xf32>
    %50 = arith.subf %49, %48 : vector<16x128xf32>
    %51 = arith.mulf %44, %50 : vector<16x128xf32>
    %cst_33 = arith.constant 1.000000e+00 : f32
    %52 = vector.broadcast %cst_33 : f32 to vector<16x128xf32>
    %53 = arith.addf %52, %44 : vector<16x128xf32>
    %54 = math.log %53 : vector<16x128xf32>
    %55 = arith.select %46, %51, %54 : vector<16x128xi1>, vector<16x128xf32>
    %cst_34 = arith.constant 0.000000e+00 : f32
    %56 = vector.broadcast %cst_34 : f32 to vector<16x128xf32>
    %57 = arith.minimumf %40, %56 : vector<16x128xf32>
    %58 = arith.subf %57, %55 : vector<16x128xf32>
    %cst_35 = arith.constant 0.000000e+00 : f32
    %59 = vector.broadcast %cst_35 : f32 to vector<16x128xf32>
    %60 = arith.select %9, %58, %59 : vector<16x128xi1>, vector<16x128xf32>
    %cst_36 = arith.constant 0.000000e+00 : f32
    %61 = vector.broadcast %cst_36 : f32 to vector<16x128xf32>
    %62 = arith.cmpf oge, %40, %61 : vector<16x128xf32>
    %cst_37 = arith.constant 1.000000e+00 : f32
    %63 = vector.broadcast %cst_37 : f32 to vector<16x128xf32>
    %64 = arith.select %62, %63, %44 : vector<16x128xi1>, vector<16x128xf32>
    %cst_38 = arith.constant 1.000000e+00 : f32
    %65 = vector.broadcast %cst_38 : f32 to vector<16x128xf32>
    %66 = arith.addf %65, %44 : vector<16x128xf32>
    %67 = tpu.reciprocal %66 {approx = true} : vector<16x128xf32> -> vector<16x128xf32>
    %68 = arith.mulf %64, %67 : vector<16x128xf32>
    %cst_39 = arith.constant 1.000000e+00 : f32
    %69 = vector.broadcast %cst_39 : f32 to vector<16x128xf32>
    %70 = arith.select %9, %68, %69 : vector<16x128xi1>, vector<16x128xf32>
    %71 = arith.addf %17, %37 : vector<16x128xf32>
    %72 = arith.mulf %71, %70 : vector<16x128xf32>
    %cst_40 = arith.constant dense<0.000000e+00> : vector<128xf32>
    %73 = vector.multi_reduction <add>, %60, %cst_40 [0] : vector<16x128xf32> to vector<128xf32>
    %74 = vector.shape_cast %73 : vector<128xf32> to vector<1x128xf32>
    %75 = arith.addf %10, %74 : vector<1x128xf32>
    %c0_41 = arith.constant 0 : index
    %c0_42 = arith.constant 0 : index
    %76 = vector.load %arg10[%c0_41, %c0_42] : memref<16x128xf32, #tpu.memory_space<vmem>>, vector<16x128xf32>
    tpu.vector_store %arg10[%c0_41, %c0_42], %72 {strides = array<i32>} : memref<16x128xf32, #tpu.memory_space<vmem>>, vector<16x128xf32>,
    %c0_43 = arith.constant 0 : index
    %c0_44 = arith.constant 0 : index
    %c0_45 = arith.constant 0 : index
    %77 = vector.load %arg11[%c0_43, %c0_44, %c0_45] : memref<1x1x128xf32, #tpu.memory_space<vmem>>, vector<1x1x128xf32>
    %78 = vector.shape_cast %77 : vector<1x1x128xf32> to vector<1x128xf32>
    %79 = vector.shape_cast %75 : vector<1x128xf32> to vector<1x1x128xf32>
    tpu.vector_store %arg11[%c0_43, %c0_44, %c0_45], %79 {strides = array<i32>} : memref<1x1x128xf32, #tpu.memory_space<vmem>>, vector<1x1x128xf32>,
    return
  }
  func.func @transform_0(%arg0: i32) -> (i32, i32) {
    %c0_i32 = arith.constant 0 : i32
    %c0_i32_0 = arith.constant 0 : i32
    return %arg0, %c0_i32 : i32, i32
  }
  func.func @transform_1(%arg0: i32) -> (i32, i32) {
    %c0_i32 = arith.constant 0 : i32
    %c0_i32_0 = arith.constant 0 : i32
    return %arg0, %c0_i32 : i32, i32
  }
  func.func @transform_2(%arg0: i32) -> (i32, i32, i32) {
    %c0_i32 = arith.constant 0 : i32
    %c0_i32_0 = arith.constant 0 : i32
    %c0_i32_1 = arith.constant 0 : i32
    %c0_i32_2 = arith.constant 0 : i32
    return %c0_i32, %c0_i32_0, %c0_i32_1 : i32, i32, i32
  }
  func.func @transform_3(%arg0: i32) -> (i32, i32, i32) {
    %c0_i32 = arith.constant 0 : i32
    %c0_i32_0 = arith.constant 0 : i32
    %c0_i32_1 = arith.constant 0 : i32
    %c0_i32_2 = arith.constant 0 : i32
    return %c0_i32, %c0_i32_0, %c0_i32_1 : i32, i32, i32
  }
  func.func @transform_4(%arg0: i32) -> (i32, i32, i32) {
    %c0_i32 = arith.constant 0 : i32
    %c0_i32_0 = arith.constant 0 : i32
    %c0_i32_1 = arith.constant 0 : i32
    %c0_i32_2 = arith.constant 0 : i32
    return %c0_i32, %c0_i32_0, %c0_i32_1 : i32, i32, i32
  }
  func.func @transform_5(%arg0: i32) -> (i32, i32) {
    %c0_i32 = arith.constant 0 : i32
    %c0_i32_0 = arith.constant 0 : i32
    %c0_i32_1 = arith.constant 0 : i32
    return %c0_i32, %c0_i32_0 : i32, i32
  }
  func.func @transform_6(%arg0: i32) -> (i32, i32, i32) {
    %c0_i32 = arith.constant 0 : i32
    %c0_i32_0 = arith.constant 0 : i32
    %c0_i32_1 = arith.constant 0 : i32
    %c0_i32_2 = arith.constant 0 : i32
    return %c0_i32, %c0_i32_0, %c0_i32_1 : i32, i32, i32
  }
  func.func @transform_7(%arg0: i32) -> (i32, i32, i32) {
    %c0_i32 = arith.constant 0 : i32
    %c0_i32_0 = arith.constant 0 : i32
    %c0_i32_1 = arith.constant 0 : i32
    %c0_i32_2 = arith.constant 0 : i32
    return %c0_i32, %c0_i32_0, %c0_i32_1 : i32, i32, i32
  }
  func.func @transform_8(%arg0: i32) -> (i32, i32, i32) {
    %c0_i32 = arith.constant 0 : i32
    %c0_i32_0 = arith.constant 0 : i32
    %c0_i32_1 = arith.constant 0 : i32
    %c0_i32_2 = arith.constant 0 : i32
    return %c0_i32, %c0_i32_0, %c0_i32_1 : i32, i32, i32
  }
  func.func @transform_9(%arg0: i32) -> (i32, i32) {
    %c0_i32 = arith.constant 0 : i32
    %c0_i32_0 = arith.constant 0 : i32
    return %arg0, %c0_i32 : i32, i32
  }
  func.func @transform_10(%arg0: i32) -> (i32, i32, i32) {
    %c0_i32 = arith.constant 0 : i32
    %c0_i32_0 = arith.constant 0 : i32
    %c0_i32_1 = arith.constant 0 : i32
    return %arg0, %c0_i32, %c0_i32_0 : i32, i32, i32
  }
}

</mosaic_0001>

<bundles_post_ra>
// kernel: flow_upsampler_encode.2
= control target key start
LH: loop header
LB: loop body
LE: loop exit
PB: predicated region body
PF: predicated region fallthrough
CT: control target
= control target key end

     0   :  { %s1711_s13 = smov 0   ;;  %s2125_s0 = inlined_call_operand.vmem [shape: f32[128,128], index: 0, kind: input, shape index: {}]   ;;  %s2126_s1 = inlined_call_operand.vmem [shape: bf16[128,64], index: 1, kind: input, shape index: {}]   ;;  %s2127_s2 = inlined_call_operand.vmem [shape: f32[1,128,128], index: 2, kind: input, shape index: {}]   ;;  %s2128_s3 = inlined_call_operand.vmem [shape: f32[1,1,128], index: 3, kind: input, shape index: {}]   ;;  %s2129_s4 = inlined_call_operand.vmem [shape: bf16[1,128,128], index: 4, kind: input, shape index: {}]   ;;  %s2130_s5 = inlined_call_operand.vmem [shape: bf16[64,128], index: 5, kind: input, shape index: {}]   ;;  %s2131_s6 = inlined_call_operand.vmem [shape: f32[1,1,128], index: 6, kind: input, shape index: {}]   ;;  %s2132_s7 = inlined_call_operand.vmem [shape: bf16[1,128,256], index: 7, kind: input, shape index: {}]   ;;  %s2133_s8 = inlined_call_operand.vmem [shape: f32[1,1,256], index: 8, kind: input, shape index: {}]   ;;  %s2134_s9 = inlined_call_operand.vmem [shape: f32[128,128], index: 9, kind: output, shape index: {0}]   ;;  %s2135_s10 = inlined_call_operand.vmem [shape: f32[2,1,128], index: 10, kind: output, shape index: {1}]  }
   0x1 LB: > { %s1717_s14 = sadd.s32 4294967295, %s1653_s13   ;;  %p1319_p0 = scmp.ge.s32.totalorder %s1653_s13, 1  ;;  %s1653_s13 = sphi %s1711_s13, %s21_s13  }
   0x2   : > { %p327_p1 = scmp.lt.s32.totalorder %s1653_s13, 3 }
   0x4   : > { %p328_p2 = pnand %p1319_p0, %p327_p1 }
   0x5   : > { %v1559_v0 = vld [vmem:[%s2130_s5] sm:$0xff] (!%p328_p2)   ;;  %s1320_s17 = sshll.u32 (!%p328_p2), %s1717_s14, 3  ;;  %v1560_v1 = vld [vmem:[%s2130_s5 + $0x8] sm:$0xff] (!%p328_p2)   ;;  %v1561_v2 = vld [vmem:[%s2130_s5 + $0x10] sm:$0xff] (!%p328_p2)   ;;  %vm463_vm0 = vcmask (!%p328_p2), 523264   ;;  %p391_p4 = scmp.lt.s32.totalorder (!%p328_p2), %s1717_s14, 1 }
   0x6   : > { %331 = sbr.rel (%p328_p2) target bundleno = 568 (0x238), region = 56  ;;  %p374_p3 = scmp.lt.s32.totalorder (!%p328_p2), %s1320_s17, 15  ;;  %1410 = vmatprep.subr.bf16.mxu0 (!%p328_p2), %v1559_v0  ;;  %v1562_v4 = vld [vmem:[%s2130_s5 + $0x18] sm:$0xff] (!%p328_p2)   ;;  %v1564_v5 = vld [vmem:[%s2129_s4] sm:$0xff] (!%p328_p2)   ;;  %v1566_v8 = vld [vmem:[%s2129_s4 + $0x8] sm:$0xff] (!%p328_p2)  }
   0x7   : > { %1411 = vmatpush3.bf16.msra.mxu0 (!%p328_p2), %v1559_v0  ;;  %v546_v10 = vld [vmem:[%s2127_s2] sm:$0xff] (!%p328_p2)  ;;  %v547_v11 = vld [vmem:[%s2127_s2 + $0x8] sm:$0xff] (!%p328_p2)  ;;  %v548_v12 = vld [vmem:[%s2127_s2 + $0x10] sm:$0xff] (!%p328_p2) }
   0x8   : > { %1412 = vmatprep.subr.bf16.mxu0 (!%p328_p2), %v1560_v1  ;;  %v549_v13 = vld [vmem:[%s2127_s2 + $0x18] sm:$0xff] (!%p328_p2)  ;;  %v1567_v14 = vld [vmem:[%s2129_s4 + $0x10] sm:$0xff] (!%p328_p2)   ;;  %v1494_v16 = vpack.c.bf16 (!%p328_p2), %v547_v11, %v546_v10  ;;  %v550_v19 = vld [vmem:[%s2127_s2 + $0x20] sm:$0xff] (!%p328_p2) }
   0x9   : > { %v1498_v17 = vpack.c.bf16 (!%p328_p2), %v549_v13, %v548_v12  ;;  %v551_v20 = vld [vmem:[%s2127_s2 + $0x28] sm:$0xff] (!%p328_p2)  ;;  %v1568_v22 = vld [vmem:[%s2129_s4 + $0x18] sm:$0xff] (!%p328_p2)   ;;  %v552_v24 = vld [vmem:[%s2127_s2 + $0x30] sm:$0xff] (!%p328_p2) }
   0xa   : > { %1495 = vmatprep.subr.bf16.mxu1 (!%p328_p2), %v1494_v16  ;;  %v1502_v23 = vpack.c.bf16 (!%p328_p2), %v551_v20, %v550_v19  ;;  %v553_v25 = vld [vmem:[%s2127_s2 + $0x38] sm:$0xff] (!%p328_p2)  ;;  %v1569_v26 = vld [vmem:[%s2129_s4 + $0x20] sm:$0xff] (!%p328_p2)   ;;  %v555_v29 = vld [vmem:[%s2127_s2 + $0x48] sm:$0xff] (!%p328_p2) }
   0xb   : > { %1413 = vmatpush3.bf16.msra.mxu0 (!%p328_p2), %v1560_v1  ;;  %1497 = vmatpush3.bf16.msra.mxu1 (!%p328_p2), %v1494_v16  ;;  %v1506_v27 = vpack.c.bf16 (!%p328_p2), %v553_v25, %v552_v24  ;;  %v554_v28 = vld [vmem:[%s2127_s2 + $0x40] sm:$0xff] (!%p328_p2)  ;;  %v1570_v30 = vld [vmem:[%s2129_s4 + $0x28] sm:$0xff] (!%p328_p2)   ;;  %v556_v32 = vld [vmem:[%s2127_s2 + $0x50] sm:$0xff] (!%p328_p2) }
   0xc   : > { %1414 = vmatprep.subr.bf16.mxu0 (!%p328_p2), %v1561_v2  ;;  %1499 = vmatprep.subr.bf16.mxu1 (!%p328_p2), %v1498_v17  ;;  %v1510_v31 = vpack.c.bf16 (!%p328_p2), %v555_v29, %v554_v28  ;;  %v557_v33 = vld [vmem:[%s2127_s2 + $0x58] sm:$0xff] (!%p328_p2)  ;;  %v1573_v34 = vld [vmem:[%s2129_s4 + $0x30] sm:$0xff] (!%p328_p2)   ;;  %v558_v36 = vld [vmem:[%s2127_s2 + $0x60] sm:$0xff] (!%p328_p2) }
   0xd   : > { %s2139_s17 = smov (!%p374_p3, %s1320_s17), 15  ;;  %v1514_v35 = vpack.c.bf16 %v557_v33, %v556_v32  ;;  %v559_v37 = vld [vmem:[%s2127_s2 + $0x68] sm:$0xff]  ;;  %v1574_v38 = vld [vmem:[%s2129_s4 + $0x38] sm:$0xff]   ;;  %v560_v40 = vld [vmem:[%s2127_s2 + $0x70] sm:$0xff]  ;;  %s2141_s14 = smov (!%p391_p4, %s1717_s14), 1 }
   0xe   : > { %s1323_s22 = sshll.u32 %s2139_s17, 2  ;;  %s1321_s28 = sshll.u32 %s2139_s17, 3  ;;  %v1518_v39 = vpack.c.bf16 %v559_v37, %v558_v36  ;;  %v561_v41 = vld [vmem:[%s2127_s2 + $0x78] sm:$0xff]  ;;  %v1577_v46 = vld [vmem:[%s2132_s7 + $0x4] ss:$8 sps:$4 sm:$0xff]  }
   0xf   : > { %s1737_s25 = scalar_lea.vmem %s2126_s1, %s1323_s22  ;;  %1415 = vmatpush3.bf16.msra.mxu0 %v1561_v2  ;;  %s1753_s15 = scalar_lea.vmem %s2125_s0, %s1321_s28  ;;  %1501 = vmatpush3.bf16.msra.mxu1 %v1498_v17  ;;  %v1522_v47 = vpack.c.bf16 %v561_v41, %v560_v40  ;;  %v1575_v50 = vld [vmem:[%s2132_s7] ss:$8 sps:$4 sm:$0xff]   ;;  %v1580_v51 = vld [vmem:[%s2132_s7 + $0x14] ss:$8 sps:$4 sm:$0xff]   ;;  %v1578_v54 = vld [vmem:[%s2132_s7 + $0x10] ss:$8 sps:$4 sm:$0xff]  }
  0x10   : > { %v1563_v3 = vld [vmem:[%s1737_s25] sm:$0xff]   ;;  %1416 = vmatprep.subr.bf16.mxu0 %v1562_v4  ;;  %v1565_v6 = vld [vmem:[%s1737_s25 + $0x8] sm:$0xff]   ;;  %v1571_v7 = vld [vmem:[%s1737_s25 + $0x10] sm:$0xff]   ;;  %1503 = vmatprep.subr.bf16.mxu1 %v1502_v23  ;;  %s2029_s27 = scalar_lea.vmem %s2134_s9, %s1321_s28  ;;  %s393_s29 = scalar_lea.vmem %s2135_s10, %s2141_s14 }
  0x11   : > { %1418 = vmatprep.mubr.msk.bf16.mxu0 %vm463_vm0, %v1563_v3  ;;  %v395_v9 = vld [vmem:[%s1753_s15] sm:$0xff]  ;;  %v1779_v15 = vld [vmem:[%s1753_s15 + $0x8] sm:$0xff]  ;;  %v1572_v18 = vld [vmem:[%s1737_s25 + $0x18] sm:$0xff]  }
  0x12   : > { %1458 = vmatprep.mubr.f32.mxu1 %v395_v9  ;;  %v674_v21 = vpack.c.bf16 %v1779_v15, %v395_v9  ;;  %v397_v42 = vld [vmem:[%s1753_s15 + $0x10] sm:$0xff]  ;;  %v398_v43 = vld [vmem:[%s1753_s15 + $0x18] sm:$0xff]  ;;  %v399_v44 = vld [vmem:[%s1753_s15 + $0x20] sm:$0xff] }
  0x13   : > { %1417 = vmatpush3.bf16.msra.mxu0 %v1562_v4  ;;  %1505 = vmatpush3.bf16.msra.mxu1 %v1502_v23  ;;  %v400_v45 = vld [vmem:[%s1753_s15 + $0x28] sm:$0xff]  ;;  %v675_v48 = vpack.c.bf16 %v398_v43, %v397_v42  ;;  %v401_v52 = vld [vmem:[%s1753_s15 + $0x30] sm:$0xff]  ;;  %v402_v53 = vld [vmem:[%s1753_s15 + $0x38] sm:$0xff]  ;;  %v1655_v4 = vmov 0  }
  0x14   : > { %1470 = vmatprep.subr.bf16.mxu0 %v1564_v5  ;;  %1507 = vmatprep.subr.bf16.mxu1 %v1506_v27  ;;  %v676_v49 = vpack.c.bf16 %v400_v45, %v399_v44  ;;  %v1583_v55 = vld [vmem:[%s2132_s7 + $0x24] ss:$8 sps:$4 sm:$0xff]   ;;  %v677_v56 = vpack.c.bf16 %v402_v53, %v401_v52  ;;  %v1581_v57 = vld [vmem:[%s2132_s7 + $0x20] ss:$8 sps:$4 sm:$0xff]   ;;  %v1586_v58 = vld [vmem:[%s2132_s7 + $0x34] ss:$8 sps:$4 sm:$0xff]  }
  0x15   : > { %v1584_v59 = vld [vmem:[%s2132_s7 + $0x30] ss:$8 sps:$4 sm:$0xff]   ;;  %v1589_v60 = vld [vmem:[%s2132_s7 + $0x44] ss:$8 sps:$4 sm:$0xff]   ;;  %v1587_v61 = vld [vmem:[%s2132_s7 + $0x40] ss:$8 sps:$4 sm:$0xff]  }
  0x16   : > { %1419 = vmatmul.mubr.msk.bf16.vlgmr.msra.gmra.mrb[0].mxu0 %vm463_vm0, %v1565_v6  ;;  %v1592_v62 = vld [vmem:[%s2132_s7 + $0x54] ss:$8 sps:$4 sm:$0xff]   ;;  %v1590_v63 = vld [vmem:[%s2132_s7 + $0x50] ss:$8 sps:$4 sm:$0xff]   ;;  %v1595_v0 = vld [vmem:[%s2132_s7 + $0x64] ss:$8 sps:$4 sm:$0xff]  }
  0x17   : > { %1471 = vmatpush3.bf16.msra.mxu0 %v1564_v5  ;;  %1422 = vmatprep.mubr.msk.bf16.mxu0 %vm463_vm0, %v1571_v7  ;;  %v1593_v1 = vld [vmem:[%s2132_s7 + $0x60] ss:$8 sps:$4 sm:$0xff]   ;;  %v1598_v2 = vld [vmem:[%s2132_s7 + $0x74] ss:$8 sps:$4 sm:$0xff]   ;;  %v1596_v3 = vld [vmem:[%s2132_s7 + $0x70] ss:$8 sps:$4 sm:$0xff]  }
  0x18   : > { %1472 = vmatprep.subr.bf16.mxu0 %v1566_v8  ;;  %1509 = vmatpush3.bf16.msra.mxu1 %v1506_v27  ;;  %v1347_v5 = vld [vmem:[%s2131_s6] ss:$0 sm:$0xff] }
  0x19   : > { %1511 = vmatprep.subr.bf16.mxu1 %v1510_v31 }
  0x1b   : > { %1473 = vmatpush3.bf16.msra.mxu0 %v1566_v8 }
  0x1c   : > { %1474 = vmatprep.subr.bf16.mxu0 %v1567_v14  ;;  %1513 = vmatpush3.bf16.msra.mxu1 %v1510_v31 }
  0x1d   : > { %1515 = vmatprep.subr.bf16.mxu1 %v1514_v35 }
  0x1e   : > { %1423 = vmatmul.mubr.msk.bf16.gmra.mrb[4].mxu0 %vm463_vm0, %v1572_v18 }
  0x1f   : > { %1475 = vmatpush3.bf16.msra.mxu0 %v1567_v14  ;;  %1486 = vmatprep.mubr.bf16.mxu0 %v674_v21 }
  0x20   : > { %1476 = vmatprep.subr.bf16.mxu0 %v1568_v22  ;;  %1517 = vmatpush3.bf16.msra.mxu1 %v1514_v35 }
  0x21   : > { %1519 = vmatprep.subr.bf16.mxu1 %v1518_v39 }
  0x23   : > { %1477 = vmatpush3.bf16.msra.mxu0 %v1568_v22 }
  0x24   : > { %1478 = vmatprep.subr.bf16.mxu0 %v1569_v26  ;;  %1521 = vmatpush3.bf16.msra.mxu1 %v1518_v39 }
  0x25   : > { %1523 = vmatprep.subr.bf16.mxu1 %v1522_v47 }
  0x27   : > { %1479 = vmatpush3.bf16.msra.mxu0 %v1569_v26 }
  0x28   : > { %1480 = vmatprep.subr.bf16.mxu0 %v1570_v30  ;;  %1525 = vmatpush3.bf16.msra.mxu1 %v1522_v47 }
  0x29   : > { %1526 = vmatprep.subr.bf16.mxu1 %v1577_v46 }
  0x2b   : > { %1481 = vmatpush3.bf16.msra.mxu0 %v1570_v30  ;;  %1459 = vmatmul.mubr.f32.vlgmr.msra.gmra.mrb[0].mxu1 %v1779_v15 }
  0x2c   : > { %1482 = vmatprep.subr.bf16.mxu0 %v1573_v34  ;;  %1534 = vmatpush1.bf16.msra.mxu1 %v1575_v50 }
  0x2d   : > { %1527 = vmatprep.subr.bf16.mxu1 %v1580_v51  ;;  %1461 = vmatprep.mubr.f32.mxu1 %v397_v42  ;;  %v541_v42 = vlaneseq }
  0x2f   : > { %1483 = vmatpush3.bf16.msra.mxu0 %v1573_v34  ;;  %1462 = vmatmul.mubr.f32.gmra.mrb[2].mxu1 %v398_v43  ;;  %v853_v43 = vshrl.u32 %v541_v42, 7 }
  0x30   : > { %1484 = vmatprep.subr.bf16.mxu0 %v1574_v38  ;;  %1535 = vmatpush1.bf16.msra.mxu1 %v1578_v54 }
  0x31   : > { %1528 = vmatprep.subr.bf16.mxu1 %v1583_v55  ;;  %1464 = vmatprep.mubr.f32.mxu1 %v399_v44  ;;  %v854_v44 = vsub.s32 0, %v853_v43 }
  0x33   : > { %1485 = vmatpush3.bf16.msra.mxu0 %v1574_v38  ;;  %1465 = vmatmul.mubr.f32.gmra.mrb[4].mxu1 %v400_v45  ;;  %v850_v45 = vld [vmem:[%s2133_s8] sm:$0x3] }
  0x34   : > { %942 = vmatprep.subr.bf16.mxu0 %v1577_v46  ;;  %1536 = vmatpush1.bf16.msra.mxu1 %v1581_v57  ;;  %v858_v46 = vsub.s32 1, %v853_v43  ;;  %v1901_v47 = vrot.slane %v850_v45, %v854_v44 }
  0x35   : > { %1529 = vmatprep.subr.bf16.mxu1 %v1586_v58  ;;  %1467 = vmatprep.mubr.f32.mxu1 %v401_v52 }
  0x36   : > { %1487 = vmatmul.mubr.bf16.vlgmr.msra.gmra.mrb[0].mxu0 %v675_v48  ;;  %v1903_v48 = vrot.slane %v850_v45, %v858_v46 }
  0x37   : > { %1490 = vmatprep.mubr.bf16.mxu0 %v676_v49  ;;  %943 = vmatpush1.bf16.msra.mxu0 %v1575_v50  ;;  %v1908_v49 = vld [vmem:[%s2128_s3] ss:$0 sm:$0xff] }
  0x38   : > { %944 = vmatprep.subr.bf16.mxu0 %v1580_v51  ;;  %1468 = vmatmul.mubr.f32.gmra.mrb[6].mxu1 %v402_v53 }
  0x39   : > { %1537 = vmatpush1.bf16.msra.mxu1 %v1584_v59  ;;  %984 = vmatprep.mubr.bf16.mxu1 %v1655_v4 }
  0x3a   : > { %1530 = vmatprep.subr.bf16.mxu1 %v1589_v60 }
  0x3b   : > { %945 = vmatpush1.bf16.msra.mxu0 %v1578_v54 }
  0x3c   : > { %946 = vmatprep.subr.bf16.mxu0 %v1583_v55 }
  0x3d   : > { %1538 = vmatpush1.bf16.msra.mxu1 %v1587_v61 }
  0x3e   : > { %1491 = vmatmul.mubr.bf16.gmra.mrb[4].mxu0 %v677_v56  ;;  %1531 = vmatprep.subr.bf16.mxu1 %v1592_v62 }
  0x3f   : > { %947 = vmatpush1.bf16.msra.mxu0 %v1581_v57  ;;  %974 = vmatprep.mubr.bf16.mxu0 %v1655_v4 }
  0x40   : > { %948 = vmatprep.subr.bf16.mxu0 %v1586_v58 }
  0x41   : > { %1539 = vmatpush1.bf16.msra.mxu1 %v1590_v63 }
  0x42   : > { %1532 = vmatprep.subr.bf16.mxu1 %v1595_v0 }
  0x43   : > { %949 = vmatpush1.bf16.msra.mxu0 %v1584_v59 }
  0x44   : > { %950 = vmatprep.subr.bf16.mxu0 %v1589_v60 }
  0x45   : > { %1540 = vmatpush1.bf16.msra.mxu1 %v1593_v1 }
  0x46   : > { %1533 = vmatprep.subr.bf16.mxu1 %v1598_v2 }
  0x47   : > { %951 = vmatpush1.bf16.msra.mxu0 %v1587_v61 }
  0x48   : > { %952 = vmatprep.subr.bf16.mxu0 %v1592_v62 }
  0x49   : > { %1541 = vmatpush1.bf16.msra.mxu1 %v1596_v3 }
  0x4b   : > { %953 = vmatpush1.bf16.msra.mxu0 %v1590_v63 }
  0x4c   : > { %954 = vmatprep.subr.bf16.mxu0 %v1595_v0 }
  0x4f   : > { %955 = vmatpush1.bf16.msra.mxu0 %v1593_v1 }
  0x50   : > { %956 = vmatprep.subr.bf16.mxu0 %v1598_v2 }
  0x53   : > { %957 = vmatpush1.bf16.msra.mxu0 %v1596_v3 }
  0xfe   : > { %v1460_v16 = vpop.f32.mrb[0].mxu1 }
  0xff   : > { %v635_v19 = vpop.f32.mrb[1].mxu1  ;;  %v641_v55 = vadd.f32 %v1460_v16, %v1908_v49 }
 0x100   : > { %v636_v56 = vadd.f32 %v1908_v49, %v635_v19 }
 0x102   : > { %v1463_v25 = vpop.f32.mrb[2].mxu1 }
 0x103   : > { %v645_v28 = vpop.f32.mrb[3].mxu1  ;;  %v651_v61 = vadd.f32 %v1463_v25, %v1908_v49 }
 0x104   : > { %v646_v51 = vadd.f32 %v1908_v49, %v645_v28 }
 0x106   : > { %v1466_v34 = vpop.f32.mrb[4].mxu1 }
 0x107   : > { %v655_v37 = vpop.f32.mrb[5].mxu1 }
 0x109   : > { %v1488_v6 = vpop.f32.mrb[0].mxu0 }
 0x10a   : > { %v816_v7 = vadd.f32 %v1488_v6, %v1347_v5  ;;  %v776_v8 = vpop.f32.mrb[1].mxu0 }
 0x10b   : > { %v814_v9 = vadd.f32 %v1347_v5, %v776_v8  ;;  %v1489_v10 = vpop.f32.mrb[2].mxu0  ;;  %v1893_v40 = vpop.f32.mrb[6].mxu1 }
 0x10c   : > { %v817_v11 = vadd.f32 %v1489_v10, %v1347_v5  ;;  %v779_v12 = vpop.f32.mrb[3].mxu0  ;;  %v824_v14 = vmax.f32 %v816_v7, 0.0  ;;  %v1895_v41 = vpop.f32.mrb[7].mxu1 }
 0x10d   : > { %v815_v13 = vadd.f32 %v1347_v5, %v779_v12  ;;  %v822_v17 = vmax.f32 %v814_v9, 0.0  ;;  %v666_v44 = vadd.f32 %v1908_v49, %v1895_v41  ;;  %v542_v41 = vand.u32 127, %v541_v42 }
 0x10e   : > { %v825_v15 = vmax.f32 %v817_v11, 0.0 }
 0x10f   : > { %v823_v18 = vmax.f32 %v815_v13, 0.0  ;;  %vm543_vm1 = vcmp.ge.s32.totalorder %v542_v41, 6  ;;  %vm544_vm2 = vcmp.lt.s32.totalorder %v542_v41, 12 }
 0x110   : > { %v831_v20 = vpack.c.bf16 %v825_v15, %v824_v14  ;;  %vm2016_vm10 = vmand %vm543_vm1, %vm544_vm2 }
 0x111   : > { %v830_v21 = vpack.c.bf16 %v823_v18, %v822_v17  ;;  %v1492_v22 = vpop.f32.mrb[4].mxu0 }
 0x112   : > { %v820_v23 = vadd.f32 %v1492_v22, %v1347_v5  ;;  %v792_v24 = vpop.f32.mrb[5].mxu0  ;;  %985 = vmatmul.mubr.bf16.vlgmr.msra.gmra.mrb[8].mxu1 %v831_v20  ;;  %v656_v22 = vadd.f32 %v1908_v49, %v655_v37 }
 0x113   : > { %v818_v26 = vadd.f32 %v1347_v5, %v792_v24  ;;  %v1493_v27 = vpop.f32.mrb[6].mxu0  ;;  %975 = vmatmul.mubr.bf16.vlgmr.msra.gmra.mrb[8].mxu0 %v830_v21  ;;  %994 = vmatprep.mubr.bf16.mxu1 %v1655_v4 }
 0x114   : > { %v821_v29 = vadd.f32 %v1493_v27, %v1347_v5  ;;  %v795_v30 = vpop.f32.mrb[7].mxu0  ;;  %v828_v32 = vmax.f32 %v820_v23, 0.0  ;;  %v661_v27 = vadd.f32 %v1466_v34, %v1908_v49 }
 0x115   : > { %v819_v31 = vadd.f32 %v1347_v5, %v795_v30  ;;  %v826_v35 = vmax.f32 %v818_v26, 0.0 }
 0x116   : > { %v829_v33 = vmax.f32 %v821_v29, 0.0 }
 0x117   : > { %v827_v36 = vmax.f32 %v819_v31, 0.0 }
 0x118   : > { %v833_v38 = vpack.c.bf16 %v829_v33, %v828_v32 }
 0x119   : > { %v832_v39 = vpack.c.bf16 %v827_v36, %v826_v35 }
 0x11b   : > { %995 = vmatmul.mubr.bf16.gmra.mrb[12].mxu1 %v832_v39 }
 0x11c   : > { %1004 = vmatprep.mubr.bf16.mxu1 %v1655_v4 }
 0x123   : > { %1005 = vmatmul.mubr.bf16.gmra.mrb[16].mxu1 %v833_v38 }
 0x1e5   : > { %v986_v50 = vpop.f32.mrb[8].mxu1 }
 0x1e6   : > { %v987_v52 = vadd.f32 %v986_v50, %v1901_v47  ;;  %v976_v53 = vpop.f32.mrb[8].mxu0  ;;  %v988_v54 = vpop.f32.mrb[9].mxu1 }
 0x1e7   : > { %v977_v57 = vadd.f32 %v976_v53, %v1901_v47  ;;  %v989_v58 = vadd.f32 %v988_v54, %v1903_v48  ;;  %v978_v59 = vpop.f32.mrb[9].mxu0  ;;  %v990_v60 = vpop.f32.mrb[10].mxu1  ;;  %v671_v54 = vadd.f32 %v1893_v40, %v1908_v49 }
 0x1e8   : > { %v1917_v62 = vadd.f32 %v987_v52, %v646_v51  ;;  %v979_v63 = vadd.f32 %v978_v59, %v1903_v48  ;;  %v991_v0 = vadd.f32 %v990_v60, %v1901_v47  ;;  %v980_v1 = vpop.f32.mrb[10].mxu0  ;;  %v992_v2 = vpop.f32.mrb[11].mxu1 }
 0x1e9   : > { %v1921_v3 = vadd.f32 %v977_v57, %v636_v56  ;;  %v1923_v4 = vadd.f32 2.0, %v989_v58  ;;  %v981_v5 = vadd.f32 %v980_v1, %v1901_v47  ;;  %v993_v6 = vadd.f32 %v992_v2, %v1903_v48  ;;  %v982_v7 = vpop.f32.mrb[11].mxu0 }
 0x1ea   : > { %v1927_v8 = vadd.f32 2.0, %v979_v63  ;;  %v1929_v9 = vadd.f32 %v991_v0, %v651_v61  ;;  %v983_v10 = vadd.f32 %v982_v7, %v1903_v48 }
 0x1eb   : > { %v1025_v11 = vand.u32 2147483647, %v1923_v4  ;;  %v1933_v12 = vadd.f32 %v981_v5, %v641_v55  ;;  %v1936_v14 = vadd.f32 2.0, %v993_v6  ;;  %vm1145_vm3 = vcmp.ge.f32.partialorder %v1923_v4, 0.0 }
 0x1ec   : > { %v1023_v13 = vand.u32 2147483647, %v1927_v8  ;;  %v1938_v16 = vadd.f32 2.0, %v983_v10  ;;  %vm1143_vm4 = vcmp.ge.f32.partialorder %v1927_v8, 0.0 }
 0x1ed   : > { %v1033_v15 = vsub.f32 0.0, %v1025_v11  ;;  %v1026_v18 = vand.u32 2147483647, %v1936_v14  ;;  %vm1146_vm5 = vcmp.ge.f32.partialorder %v1936_v14, 0.0 }
 0x1ee   : > { %v1031_v17 = vsub.f32 0.0, %v1023_v13  ;;  %v996_v19 = vpop.f32.mrb[12].mxu1  ;;  %v1024_v21 = vand.u32 2147483647, %v1938_v16  ;;  %v1119_v13 = vmin.f32 %v1927_v8, 0.0  ;;  %vm1144_vm6 = vcmp.ge.f32.partialorder %v1938_v16, 0.0 }
 0x1ef   : > { %v1043_v20 = vmul.f32 1.442695, %v1033_v15  ;;  %v1034_v24 = vsub.f32 0.0, %v1026_v18  ;;  %v997_v25 = vadd.f32 %v996_v19, %v1901_v47  ;;  %v998_v26 = vpop.f32.mrb[13].mxu1  ;;  %v1122_v15 = vmin.f32 %v1936_v14, 0.0 }
 0x1f0   : > { %v1039_v23 = vmul.f32 1.442695, %v1031_v17  ;;  %v1032_v28 = vsub.f32 0.0, %v1024_v21  ;;  %v999_v29 = vadd.f32 %v998_v26, %v1903_v48  ;;  %v1000_v30 = vpop.f32.mrb[14].mxu1 }
 0x1f1   : > { %1599 = vpow2.f32 %v1043_v20  ;;  %v1045_v31 = vmul.f32 1.442695, %v1034_v24  ;;  %v1946_v32 = vadd.f32 %v997_v25, %v656_v22  ;;  %v1001_v33 = vadd.f32 %v1000_v30, %v1901_v47  ;;  %v1002_v35 = vpop.f32.mrb[15].mxu1 }
 0x1f2   : > { %1601 = vpow2.f32 %v1039_v23  ;;  %v1041_v36 = vmul.f32 1.442695, %v1032_v28  ;;  %v1949_v37 = vadd.f32 2.0, %v999_v29  ;;  %v1003_v38 = vadd.f32 %v1002_v35, %v1903_v48 }
 0x1f3   : > { %1603 = vpow2.f32 %v1045_v31  ;;  %v1952_v39 = vadd.f32 %v1001_v33, %v661_v27 }
 0x1f4   : > { %1605 = vpow2.f32 %v1041_v36  ;;  %v1027_v34 = vand.u32 2147483647, %v1949_v37  ;;  %v1957_v46 = vadd.f32 2.0, %v1003_v38  ;;  %v1123_v24 = vmin.f32 %v1949_v37, 0.0 }
 0x1f5   : > { %vm1147_vm11 = vcmp.ge.f32.partialorder %v1949_v37, 0.0 }
 0x1f6   : > { %v1006_v43 = vpop.f32.mrb[16].mxu1  ;;  %v1035_v45 = vsub.f32 0.0, %v1027_v34  ;;  %v1028_v60 = vand.u32 2147483647, %v1957_v46  ;;  %vm1148_vm14 = vcmp.ge.f32.partialorder %v1957_v46, 0.0 }
 0x1f7   : > { %v1007_v50 = vadd.f32 %v1006_v43, %v1901_v47  ;;  %v1008_v51 = vpop.f32.mrb[17].mxu1 }
 0x1f8   : > { %v1009_v52 = vadd.f32 %v1008_v51, %v1903_v48  ;;  %v1010_v53 = vpop.f32.mrb[18].mxu1  ;;  %v1047_v55 = vmul.f32 1.442695, %v1035_v45  ;;  %v1036_v2 = vsub.f32 0.0, %v1028_v60 }
 0x1f9   : > { %v1963_v56 = vadd.f32 %v1007_v50, %v666_v44  ;;  %v1011_v57 = vadd.f32 %v1010_v53, %v1901_v47  ;;  %v1012_v58 = vpop.f32.mrb[19].mxu1  ;;  %v1121_v47 = vmin.f32 %v1923_v4, 0.0 }
 0x1fa   : > { %1607 = vpow2.f32 %v1047_v55  ;;  %v1970_v61 = vadd.f32 2.0, %v1009_v52  ;;  %v1013_v7 = vadd.f32 %v1012_v58, %v1903_v48  ;;  %v1049_v18 = vmul.f32 1.442695, %v1036_v2 }
 0x1fb   : > { %v1967_v59 = vpop.eup %1599  ;;  %v1972_v63 = vadd.f32 %v1011_v57, %v671_v54  ;;  %v1120_v48 = vmin.f32 %v1938_v16, 0.0 }
 0x1fc   : > { %v1974_v0 = vpop.eup %1601  ;;  %v1089_v40 = vadd.f32 1.0, %v1967_v59  ;;  %v1029_v5 = vand.u32 2147483647, %v1970_v61  ;;  %v1065_v10 = vmul.f32 0.5, %v1967_v59  ;;  %v1996_v20 = vadd.f32 2.0, %v1013_v7 }
 0x1fd   : > { %v1087_v49 = vadd.f32 1.0, %v1974_v0  ;;  %v1978_v1 = vpop.eup %1603  ;;  %v1063_v11 = vmul.f32 0.5, %v1974_v0  ;;  %vm1057_vm7 = vcmp.lt.f32.partialorder %v1967_v59, 0.0001  ;;  %v1153_v28 = vsel %vm1145_vm3, 1.0, %v1967_v59 }
 0x1fe   : > { %1609 = vlog2.f32 %v1089_v40  ;;  %v1980_v42 = vpop.eup %1605  ;;  %v1090_v6 = vadd.f32 1.0, %v1978_v1  ;;  %v1037_v19 = vsub.f32 0.0, %v1029_v5  ;;  %v1073_v22 = vsub.f32 1.0, %v1065_v10 }
 0x1ff   : > { %1611 = vrcp.f32 %v1089_v40  ;;  %v1088_v17 = vadd.f32 1.0, %v1980_v42  ;;  %v1071_v23 = vsub.f32 1.0, %v1063_v11  ;;  %v1066_v25 = vmul.f32 0.5, %v1978_v1 }
 0x200   : > { %1613 = vlog2.f32 %v1087_v49  ;;  %v1064_v26 = vmul.f32 0.5, %v1980_v42  ;;  %v1051_v29 = vmul.f32 1.442695, %v1037_v19  ;;  %v1030_v30 = vand.u32 2147483647, %v1996_v20 }
 0x201   : > { %1615 = vrcp.f32 %v1087_v49  ;;  %vm1055_vm8 = vcmp.lt.f32.partialorder %v1974_v0, 0.0001  ;;  %v1151_v33 = vsel %vm1143_vm4, 1.0, %v1974_v0  ;;  %vm1058_vm9 = vcmp.lt.f32.partialorder %v1978_v1, 0.0001 }
 0x202   : > { %1617 = vlog2.f32 %v1090_v6  ;;  %v1081_v38 = vmul.f32 %v1967_v59, %v1073_v22  ;;  %v1079_v34 = vmul.f32 %v1974_v0, %v1071_v23  ;;  %v1038_v43 = vsub.f32 0.0, %v1030_v30 }
 0x203   : > { %1619 = vrcp.f32 %v1090_v6  ;;  %v1074_v50 = vsub.f32 1.0, %v1066_v25  ;;  %v1072_v51 = vsub.f32 1.0, %v1064_v26  ;;  %v1154_v40 = vsel %vm1146_vm5, 1.0, %v1978_v1 }
 0x204   : > { %1621 = vlog2.f32 %v1088_v17  ;;  %v1998_v21 = vpop.eup %1607  ;;  %v1053_v57 = vmul.f32 1.442695, %v1038_v43  ;;  %v1152_v49 = vsel %vm1144_vm6, 1.0, %v1980_v42  ;;  %vm1056_vm12 = vcmp.lt.f32.partialorder %v1980_v42, 0.0001 }
 0x205   : > { %1623 = vrcp.f32 %v1088_v17  ;;  %v1091_v27 = vadd.f32 1.0, %v1998_v21  ;;  %v1067_v52 = vmul.f32 0.5, %v1998_v21  ;;  %v1082_v17 = vmul.f32 %v1978_v1, %v1074_v50 }
 0x206   : > { %1625 = vpow2.f32 %v1049_v18  ;;  %v1080_v19 = vmul.f32 %v1980_v42, %v1072_v51  ;;  %vm1059_vm13 = vcmp.lt.f32.partialorder %v1998_v21, 0.0001  ;;  %v1155_v1 = vsel %vm1147_vm11, 1.0, %v1998_v21 }
 0x207   : > { %1627 = vlog2.f32 %v1091_v27  ;;  %v1075_v25 = vsub.f32 1.0, %v1067_v52  ;;  %vm1149_vm0 = vcmp.ge.f32.partialorder %v1970_v61, 0.0  ;;  %vm1150_vm2 = vcmp.ge.f32.partialorder %v1996_v20, 0.0 }
 0x208   : > { %v1610_v31 = vpop.eup %1609  ;;  %1629 = vrcp.f32 %v1091_v27 }
 0x209   : > { %v1612_v35 = vpop.eup %1611  ;;  %v1100_v54 = vmul.f32 0.6931472, %v1610_v31  ;;  %1631 = vpow2.f32 %v1051_v29 }
 0x20a   : > { %v1614_v44 = vpop.eup %1613  ;;  %v1169_v45 = vmul.f32 %v1612_v35, %v1153_v28  ;;  %1633 = vpow2.f32 %v1053_v57  ;;  %v1083_v35 = vmul.f32 %v1998_v21, %v1075_v25 }
 0x20b   : > { %v1616_v53 = vpop.eup %1615  ;;  %v1096_v55 = vmul.f32 0.6931472, %v1614_v44  ;;  %v1113_v23 = vsel %vm1057_vm7, %v1081_v38, %v1100_v54 }
 0x20c   : > { %v1618_v58 = vpop.eup %1617  ;;  %v1177_v41 = vsel %vm2016_vm10, %v1169_v45, 1.0  ;;  %v1167_v60 = vmul.f32 %v1616_v53, %v1151_v33  ;;  %v1129_v8 = vsub.f32 %v1121_v47, %v1113_v23 }
 0x20d   : > { %v1620_v2 = vpop.eup %1619  ;;  %v1193_v5 = vmul.f32 %v1917_v62, %v1177_v41  ;;  %v1111_v6 = vsel %vm1055_vm8, %v1079_v34, %v1096_v55  ;;  %v1102_v7 = vmul.f32 0.6931472, %v1618_v58 }
 0x20e   : > { %v1622_v10 = vpop.eup %1621  ;;  %v1175_v11 = vsel %vm2016_vm10, %v1167_v60, 1.0  ;;  %v1170_v18 = vmul.f32 %v1620_v2, %v1154_v40  ;;  %v1127_v26 = vsub.f32 %v1119_v13, %v1111_v6  ;;  %v1137_v45 = vsel %vm2016_vm10, %v1129_v8, 0.0 }
 0x20f   : > { %v1624_v22 = vpop.eup %1623  ;;  %1215 = vst [vmem:[%s2029_s27 + $0x10] sm:$0xff] %v1193_v5  ;;  %v1191_v62 = vmul.f32 %v1921_v3, %v1175_v11  ;;  %v1098_v0 = vmul.f32 0.6931472, %v1622_v10  ;;  %v1114_v59 = vsel %vm1058_vm9, %v1082_v17, %v1102_v7  ;;  %v1124_v6 = vmin.f32 %v1957_v46, 0.0 }
 0x210   : > { %v1178_v27 = vsel %vm2016_vm10, %v1170_v18, 1.0  ;;  %v1168_v28 = vmul.f32 %v1624_v22, %v1152_v49  ;;  %v1626_v29 = vpop.eup %1625  ;;  %v1135_v16 = vsel %vm2016_vm10, %v1127_v26, 0.0  ;;  %v1130_v47 = vsub.f32 %v1122_v15, %v1114_v59 }
 0x211   : > { %1213 = vst [vmem:[%s2029_s27] sm:$0xff] %v1191_v62  ;;  %v1194_v30 = vmul.f32 %v1929_v9, %v1178_v27  ;;  %v1112_v3 = vsel %vm1056_vm12, %v1080_v19, %v1098_v0  ;;  %v1628_v31 = vpop.eup %1627  ;;  %v1092_v4 = vadd.f32 1.0, %v1626_v29  ;;  %v1068_v54 = vmul.f32 0.5, %v1626_v29 }
 0x212   : > { %v1128_v13 = vsub.f32 %v1120_v48, %v1112_v3  ;;  %v1176_v42 = vsel %vm2016_vm10, %v1168_v28, 1.0  ;;  %v1630_v33 = vpop.eup %1629  ;;  %v1104_v38 = vmul.f32 0.6931472, %v1628_v31  ;;  %v1138_v53 = vsel %vm2016_vm10, %v1130_v47, 0.0 }
 0x213   : > { %1216 = vst [vmem:[%s2029_s27 + $0x18] sm:$0xff] %v1194_v30  ;;  %v1192_v9 = vmul.f32 %v1933_v12, %v1176_v42  ;;  %v1171_v34 = vmul.f32 %v1630_v33, %v1155_v1  ;;  %v1632_v43 = vpop.eup %1631  ;;  %1635 = vlog2.f32 %v1092_v4  ;;  %v1076_v58 = vsub.f32 1.0, %v1068_v54 }
 0x214   : > { %v1136_v48 = vsel %vm2016_vm10, %v1128_v13, 0.0  ;;  %v1115_v12 = vsel %vm1059_vm13, %v1083_v35, %v1104_v38  ;;  %1637 = vrcp.f32 %v1092_v4  ;;  %v1634_v15 = vpop.eup %1633  ;;  %v1093_v55 = vadd.f32 1.0, %v1632_v43 }
 0x215   : > { %v1199_v44 = vadd.f32 %v1136_v48, %v1135_v16  ;;  %1214 = vst [vmem:[%s2029_s27 + $0x8] sm:$0xff] %v1192_v9  ;;  %v1131_v50 = vsub.f32 %v1123_v24, %v1115_v12  ;;  %v1179_v14 = vsel %vm2016_vm10, %v1171_v34, 1.0  ;;  %v1094_v37 = vadd.f32 1.0, %v1634_v15 }
 0x216   : > { %v1195_v52 = vmul.f32 %v1946_v32, %v1179_v14  ;;  %1639 = vlog2.f32 %v1093_v55  ;;  %v1069_v41 = vmul.f32 0.5, %v1632_v43  ;;  %v1070_v32 = vmul.f32 0.5, %v1634_v15 }
 0x217   : > { %v1200_v51 = vadd.f32 %v1199_v44, %v1137_v45  ;;  %v1139_v21 = vsel %vm2016_vm10, %v1131_v50, 0.0  ;;  %1641 = vrcp.f32 %v1093_v55  ;;  %v1084_v49 = vmul.f32 %v1626_v29, %v1076_v58 }
 0x218   : > { %1217 = vst [vmem:[%s2029_s27 + $0x20] sm:$0xff] %v1195_v52  ;;  %1643 = vlog2.f32 %v1094_v37  ;;  %v1156_v5 = vsel %vm1148_vm14, 1.0, %v1626_v29  ;;  %vm1060_vm15 = vcmp.lt.f32.partialorder %v1626_v29, 0.0001  ;;  %v1077_v10 = vsub.f32 1.0, %v1069_v41 }
 0x219   : > { %v1201_v57 = vadd.f32 %v1200_v51, %v1138_v53  ;;  %1645 = vrcp.f32 %v1094_v37  ;;  %v1078_v19 = vsub.f32 1.0, %v1070_v32  ;;  %v1125_v62 = vmin.f32 %v1970_v61, 0.0 }
 0x21a   : > { %v1126_v0 = vmin.f32 %v1996_v20, 0.0  ;;  %v1085_v26 = vmul.f32 %v1632_v43, %v1077_v10  ;;  %v1157_v28 = vsel %vm1149_vm0, 1.0, %v1632_v43  ;;  %vm1061_vm1 = vcmp.lt.f32.partialorder %v1632_v43, 0.0001 }
 0x21b   : > { %v1202_v24 = vadd.f32 %v1201_v57, %v1139_v21  ;;  %v1086_v61 = vmul.f32 %v1634_v15, %v1078_v19  ;;  %v1158_v8 = vsel %vm1150_vm2, 1.0, %v1634_v15  ;;  %vm1062_vm3 = vcmp.lt.f32.partialorder %v1634_v15, 0.0001 }
 0x21d   : > { %v1636_v60 = vpop.eup %1635 }
 0x21e   : > { %v1638_v40 = vpop.eup %1637  ;;  %v1106_v2 = vmul.f32 0.6931472, %v1636_v60 }
 0x21f   : > { %v1172_v7 = vmul.f32 %v1638_v40, %v1156_v5 }
 0x220   : > { %v1116_v11 = vsel %vm1060_vm15, %v1084_v49, %v1106_v2  ;;  %v1640_v22 = vpop.eup %1639 }
 0x221   : > { %v1132_v17 = vsub.f32 %v1124_v6, %v1116_v11  ;;  %v1180_v18 = vsel %vm2016_vm10, %v1172_v7, 1.0  ;;  %v1642_v25 = vpop.eup %1641  ;;  %v1108_v27 = vmul.f32 0.6931472, %v1640_v22 }
 0x222   : > { %v1196_v23 = vmul.f32 %v1952_v39, %v1180_v18  ;;  %v1644_v29 = vpop.eup %1643  ;;  %v1173_v30 = vmul.f32 %v1642_v25, %v1157_v28 }
 0x223   : > { %v1140_v46 = vsel %vm2016_vm10, %v1132_v17, 0.0  ;;  %v1646_v39 = vpop.eup %1645  ;;  %v1117_v3 = vsel %vm1061_vm1, %v1085_v26, %v1108_v27  ;;  %v1110_v31 = vmul.f32 0.6931472, %v1644_v29 }
 0x224   : > { %v1203_v59 = vadd.f32 %v1202_v24, %v1140_v46  ;;  %1218 = vst [vmem:[%s2029_s27 + $0x28] sm:$0xff] %v1196_v23  ;;  %v1133_v13 = vsub.f32 %v1125_v62, %v1117_v3  ;;  %v1181_v42 = vsel %vm2016_vm10, %v1173_v30, 1.0  ;;  %v1174_v1 = vmul.f32 %v1646_v39, %v1158_v8 }
 0x225   : > { %v1197_v33 = vmul.f32 %v1963_v56, %v1181_v42  ;;  %v1118_v9 = vsel %vm1062_vm3, %v1086_v61, %v1110_v31 }
 0x226   : > { %v1141_v20 = vsel %vm2016_vm10, %v1133_v13, 0.0  ;;  %v1134_v35 = vsub.f32 %v1126_v0, %v1118_v9  ;;  %v1182_v38 = vsel %vm2016_vm10, %v1174_v1, 1.0 }
 0x227   : > { %v1204_v4 = vadd.f32 %v1203_v59, %v1141_v20  ;;  %1219 = vst [vmem:[%s2029_s27 + $0x30] sm:$0xff] %v1197_v33  ;;  %v1198_v16 = vmul.f32 %v1972_v63, %v1182_v38 }
 0x228   : > { %v1142_v47 = vsel %vm2016_vm10, %v1134_v35, 0.0 }
 0x229   : > { %v1205_v48 = vadd.f32 %v1204_v4, %v1142_v47  ;;  %1220 = vst [vmem:[%s2029_s27 + $0x38] sm:$0xff] %v1198_v16 }
 0x22b   : > { %v1206_v34 = vrot.slane %v1205_v48, 4 }
 0x22d   : > { %v1207_v56 = vadd.f32 %v1206_v34, %v1205_v48 }
 0x22f   : > { %v1208_v43 = vrot.slane %v1207_v56, 2 }
 0x231   : > { %v1209_v44 = vadd.f32 %v1208_v43, %v1207_v56 }
 0x233   : > { %v1210_v12 = vrot.slane %v1209_v44, 1 }
 0x235   : > { %v1211_v45 = vadd.f32 %v1210_v12, %v1209_v44 }
 0x237   : > { %1221 = vst [vmem:[%s393_s29] sm:$0x1] %v1211_v45 }
 0x238 PF: > { %s21_s13 = sadd.s32 1, %s1653_s13  }
 0x239   : > { %p18_p5 = scmp.ge.s32.totalorder %s21_s13, 4  }
 0x23b   :  { %20 = sbr.rel (!%p18_p5) target bundleno = 1 (0x1), region = 101 }

// kernel: custom-call.18
= control target key start
LH: loop header
LB: loop body
LE: loop exit
PB: predicated region body
PF: predicated region fallthrough
CT: control target
= control target key end

     0   :  { %5 = vsyncpa [#allocation4], 0  ;;  %s1046_s0 = inlined_call_operand.vmem [shape: f32[48,48], index: 0, kind: input, shape index: {}]   ;;  %s1047_s1 = inlined_call_operand.vmem [shape: f32[48,48], index: 1, kind: output, shape index: {0}]   ;;  %s1048_s2 = inlined_call_operand.hbm [shape: s32[48], index: 2, kind: output, shape index: {1}]   ;;  %s1049_s3 = inlined_call_operand.hbm [shape: s32[48], index: 3, kind: output, shape index: {2}]  }
   0x1   :  { %6 = vsyncpa [#allocation7], 0  ;;  %s20_s14 = scalar_lea.vmem %s1046_s0, 40 }
   0x2   :  { %p527_p0 = scmp.gt.s32.totalorder %s1046_s0, %s20_s14 }
   0x3   :  { %s830_s17 = smov (!%p527_p0), [#allocation0]   ;;  %s834_s20 = smov (!%p527_p0), %s1046_s0  }
   0x4   :  { %528 = sbr.rel (%p527_p0) target bundleno = 21 (0x15), region = 144 }
   0xb LB: > { %v54_v0 = vld [vmem:[%s836_s20] sm:$0xff]  ;;  %s56_s20 = scalar_lea.vmem %s836_s20, 8   ;;  %s836_s20 = sphi %s834_s20, %s56_s20   ;;  %s832_s17 = sphi %s830_s17, %s57_s17  }
   0xc   : > { %55 = vst [vmem:[%s832_s17] sm:$0xff] %v54_v0  ;;  %s57_s17 = scalar_lea.vmem %s832_s17, 8   ;;  %p51_p1 = scmp.gt.s32.totalorder %s56_s20, %s20_s14 }
   0xe   :  { %53 = sbr.rel (!%p51_p1) target bundleno = 11 (0xb), region = 150 }
  0x15 PF:  { %v69_v1 = vld [vmem:[#allocation0] sm:$0xff]  ;;  %v73_v2 = vld [vmem:[#allocation0 + $0x8] sm:$0xff]  ;;  %v77_v3 = vld [vmem:[#allocation0 + $0x10] sm:$0xff]  ;;  %v92_v4 = vlaneseq  ;;  %v854_v8 = vmov 0   ;;  %s838_s0 = smov 0  }
  0x16   :  { %70 = vst [vmem:[#allocation1] sm:$0xff] %v69_v1  ;;  %74 = vst [vmem:[#allocation1 + $0x8] sm:$0xff] %v73_v2  ;;  %v81_v5 = vld [vmem:[#allocation0 + $0x18] sm:$0xff]  ;;  %v85_v6 = vld [vmem:[#allocation0 + $0x20] sm:$0xff] }
  0x17   :  { %78 = vst [vmem:[#allocation1 + $0x10] sm:$0xff] %v77_v3  ;;  %v89_v7 = vld [vmem:[#allocation0 + $0x28] sm:$0xff]  ;;  %91 = vst [vmem:[#allocation2] sm:$0x1] %v854_v8  ;;  %v887_v9 = vshrl.u32 %v92_v4, 7 }
  0x18   :  { %82 = vst [vmem:[#allocation1 + $0x18] sm:$0xff] %v81_v5  ;;  %86 = vst [vmem:[#allocation1 + $0x20] sm:$0xff] %v85_v6 }
  0x19   :  { %90 = vst [vmem:[#allocation1 + $0x28] sm:$0xff] %v89_v7 }
  0x1a LB: > { %s565_s21 = sshll.u32 %s840_s0, 3  ;;  %s100_s0 = sadd.s32 1, %s840_s0   ;;  %s840_s0 = sphi %s838_s0, %s100_s0  }
  0x1b   : > { %v104_v10 = vstv %s565_s21  ;;  %s102_s22 = scalar_lea.vmem [#allocation8], %s565_s21  ;;  %p97_p2 = scmp.ge.s32.totalorder %s100_s0, 6  }
  0x1c   : > { %v105_v11 = vadd.s32 %v104_v10, %v887_v9  ;;  %s890_s23 = smov (%p97_p2), 0  }
  0x1d   :  { %99 = sbr.rel (!%p97_p2) target bundleno = 26 (0x1a), region = 161 }
  0x1e   : > { %106 = vst [vmem:[%s102_s22] sm:$0xff] %v105_v11 }
  0x24 LB: > { %v117_v12 = vld [vmem:[#allocation1] sm:$0xff]  ;;  %v129_v13 = vld [vmem:[#allocation1 + $0x8] sm:$0xff]  ;;  %v896_v14 = vadd.s32 8, %v887_v9  ;;  %v899_v16 = vstv %s844_s23  ;;  %v141_v18 = vld [vmem:[#allocation1 + $0x10] sm:$0xff]  ;;  %v904_v19 = vadd.s32 16, %v887_v9  ;;  %v911_v24 = vadd.s32 24, %v887_v9  ;;  %s844_s23 = sphi %s890_s23, %s112_s23  }
  0x25   : > { %v118_v15 = vand.u32 2147483647, %v117_v12  ;;  %v130_v17 = vand.u32 2147483647, %v129_v13  ;;  %vm121_vm0 = vcmp.ge.s32.totalorder %v887_v9, %v899_v16  ;;  %v142_v22 = vand.u32 2147483647, %v141_v18 }
  0x26   : > { %vm133_vm3 = vcmp.ge.s32.totalorder %v896_v14, %v899_v16  ;;  %v153_v23 = vld [vmem:[#allocation1 + $0x18] sm:$0xff]  ;;  %vm145_vm6 = vcmp.ge.s32.totalorder %v904_v19, %v899_v16  ;;  %v165_v28 = vld [vmem:[#allocation1 + $0x20] sm:$0xff]  ;;  %v917_v29 = vadd.s32 32, %v887_v9  ;;  %vm157_vm9 = vcmp.ge.s32.totalorder %v911_v24, %v899_v16  ;;  %v177_v33 = vld [vmem:[#allocation1 + $0x28] sm:$0xff]  ;;  %s223_s24 = ssub.s32 128, %s844_s23  ;;  %s235_s25 = scalar_lea.vmem [#allocation1], %s844_s23 }
  0x27   : > { %vm567_vm1 = vcmp.gt.f32.partialorder %v118_v15, -inf  ;;  %v154_v27 = vand.u32 2147483647, %v153_v23  ;;  %v166_v32 = vand.u32 2147483647, %v165_v28  ;;  %v923_v34 = vadd.s32 40, %v887_v9 }
  0x28   : > { %vm125_vm2 = vmand %vm121_vm0, %vm567_vm1  ;;  %vm169_vm12 = vcmp.ge.s32.totalorder %v917_v29, %v899_v16  ;;  %v178_v37 = vand.u32 2147483647, %v177_v33  ;;  %v934_v7 = vand.u32 127, %v92_v4  ;;  %v232_v10 = vld [vmem:[#allocation2] ss:$0 sm:$0xff]  ;;  %s241_s27 = scalar_lea.vmem [#allocation8], %s844_s23 }
  0x29   : > { %v126_v20 = vsel %vm125_vm2, %v887_v9, %v899_v16  ;;  %v127_v21 = vsel %vm125_vm2, %v118_v15, -inf  ;;  %vm181_vm15 = vcmp.ge.s32.totalorder %v923_v34, %v899_v16  ;;  %v237_v11 = vld [vmem:[%s235_s25] ss:$0 sm:$0xff]  ;;  %s112_s23 = sadd.s32 1, %s844_s23  }
  0x2a   : > { %vm136_vm4 = vcmp.lt.f32.partialorder %v127_v21, %v130_v17  ;;  %v243_v12 = vld [vmem:[%s241_s27] ss:$0 sm:$0xff]  ;;  %p109_p3 = scmp.ge.s32.totalorder %s112_s23, 48  }
  0x2b   : > { %vm137_vm5 = vmand %vm133_vm3, %vm136_vm4  ;;  %s846_s5 = smov (%p109_p3), %s1047_s1   ;;  %s850_s6 = smov (%p109_p3), [#allocation1]  }
  0x2c   : > { %v138_v25 = vsel %vm137_vm5, %v896_v14, %v126_v20  ;;  %v139_v26 = vsel %vm137_vm5, %v130_v17, %v127_v21 }
  0x2d   : > { %vm148_vm7 = vcmp.lt.f32.partialorder %v139_v26, %v142_v22 }
  0x2e   : > { %vm149_vm8 = vmand %vm145_vm6, %vm148_vm7 }
  0x2f   : > { %v150_v30 = vsel %vm149_vm8, %v904_v19, %v138_v25  ;;  %v151_v31 = vsel %vm149_vm8, %v142_v22, %v139_v26 }
  0x30   : > { %vm160_vm10 = vcmp.lt.f32.partialorder %v151_v31, %v154_v27 }
  0x31   : > { %vm161_vm11 = vmand %vm157_vm9, %vm160_vm10  ;;  %vm938_vm9 = vcmp.eq.s32.totalorder %v934_v7, %v899_v16 }
  0x32   : > { %v162_v35 = vsel %vm161_vm11, %v911_v24, %v150_v30  ;;  %v163_v36 = vsel %vm161_vm11, %v154_v27, %v151_v31  ;;  %vm276_vm11 = vcmp.gt.s32.totalorder %v896_v14, %v899_v16 }
  0x33   : > { %vm172_vm13 = vcmp.lt.f32.partialorder %v163_v36, %v166_v32 }
  0x34   : > { %vm173_vm14 = vmand %vm169_vm12, %vm172_vm13  ;;  %vm261_vm12 = vcmp.gt.s32.totalorder %v887_v9, %v899_v16  ;;  %vm291_vm13 = vcmp.gt.s32.totalorder %v904_v19, %v899_v16 }
  0x35   : > { %v174_v38 = vsel %vm173_vm14, %v917_v29, %v162_v35  ;;  %v175_v39 = vsel %vm173_vm14, %v166_v32, %v163_v36 }
  0x36   : > { %vm184_vm0 = vcmp.lt.f32.partialorder %v175_v39, %v178_v37 }
  0x37   : > { %vm185_vm1 = vmand %vm181_vm15, %vm184_vm0  ;;  %vm306_vm15 = vcmp.gt.s32.totalorder %v911_v24, %v899_v16  ;;  %vm321_vm0 = vcmp.gt.s32.totalorder %v917_v29, %v899_v16 }
  0x38   : > { %v186_v40 = vsel %vm185_vm1, %v923_v34, %v174_v38  ;;  %v187_v41 = vsel %vm185_vm1, %v178_v37, %v175_v39  ;;  %vm336_vm1 = vcmp.gt.s32.totalorder %v923_v34, %v899_v16 }
  0x39   : > { %v188_v42 = vrot.slane %v187_v41, 1  ;;  %v189_v43 = vrot.slane %v186_v40, 1 }
  0x3b   : > { %vm190_vm2 = vcmp.ge.f32.partialorder %v188_v42, %v187_v41  ;;  %v193_v44 = vrot.slane %v188_v42, 1  ;;  %v194_v45 = vrot.slane %v189_v43, 1 }
  0x3c   : > { %v191_v46 = vsel %vm190_vm2, %v188_v42, %v187_v41  ;;  %v192_v47 = vsel %vm190_vm2, %v189_v43, %v186_v40  ;;  %vm280_vm2 = vmand %vm276_vm11, %vm938_vm9 }
  0x3d   : > { %vm195_vm3 = vcmp.ge.f32.partialorder %v193_v44, %v191_v46  ;;  %v198_v48 = vrot.slane %v193_v44, 1  ;;  %v199_v49 = vrot.slane %v194_v45, 1 }
  0x3e   : > { %v196_v50 = vsel %vm195_vm3, %v193_v44, %v191_v46  ;;  %v197_v51 = vsel %vm195_vm3, %v194_v45, %v192_v47  ;;  %vm265_vm3 = vmand %vm261_vm12, %vm938_vm9 }
  0x3f   : > { %vm200_vm4 = vcmp.ge.f32.partialorder %v198_v48, %v196_v50  ;;  %v203_v52 = vrot.slane %v198_v48, 1  ;;  %v204_v53 = vrot.slane %v199_v49, 1 }
  0x40   : > { %v201_v54 = vsel %vm200_vm4, %v198_v48, %v196_v50  ;;  %v202_v55 = vsel %vm200_vm4, %v199_v49, %v197_v51  ;;  %vm295_vm4 = vmand %vm291_vm13, %vm938_vm9 }
  0x41   : > { %vm205_vm5 = vcmp.ge.f32.partialorder %v203_v52, %v201_v54  ;;  %v208_v56 = vrot.slane %v203_v52, 1  ;;  %v209_v57 = vrot.slane %v204_v53, 1 }
  0x42   : > { %v206_v58 = vsel %vm205_vm5, %v203_v52, %v201_v54  ;;  %v207_v59 = vsel %vm205_vm5, %v204_v53, %v202_v55  ;;  %vm310_vm5 = vmand %vm306_vm15, %vm938_vm9 }
  0x43   : > { %vm210_vm6 = vcmp.ge.f32.partialorder %v208_v56, %v206_v58  ;;  %v213_v60 = vrot.slane %v208_v56, 1  ;;  %v214_v61 = vrot.slane %v209_v57, 1 }
  0x44   : > { %v211_v62 = vsel %vm210_vm6, %v208_v56, %v206_v58  ;;  %v212_v63 = vsel %vm210_vm6, %v209_v57, %v207_v59  ;;  %vm325_vm6 = vmand %vm321_vm0, %vm938_vm9 }
  0x45   : > { %vm215_vm7 = vcmp.ge.f32.partialorder %v213_v60, %v211_v62  ;;  %v218_v0 = vrot.slane %v213_v60, 1  ;;  %v219_v1 = vrot.slane %v214_v61, 1 }
  0x46   : > { %v216_v2 = vsel %vm215_vm7, %v213_v60, %v211_v62  ;;  %v217_v3 = vsel %vm215_vm7, %v214_v61, %v212_v63  ;;  %vm340_vm7 = vmand %vm336_vm1, %vm938_vm9 }
  0x47   : > { %vm220_vm8 = vcmp.ge.f32.partialorder %v218_v0, %v216_v2 }
  0x48   : > { %v222_v5 = vsel %vm220_vm8, %v219_v1, %v217_v3  ;;  %vm253_vm8 = vcmp.gt.s32.totalorder %v934_v7, %v899_v16 }
  0x49   : > { %224 = vrot.lane.b32.xlu0 %v222_v5, %s223_s24 }
  0xbb   : > { %v225_v6 = vpop.permute.xlu0 %224 }
  0xbc   : > { %572 = vpush %v225_v6 }
  0xed   : > { %s573_s26 = spop %572 }
  0xee   : > { %v231_v13 = vstv %s573_s26  ;;  %s236_s28 = scalar_lea.vmem [#allocation1], %s573_s26  ;;  %s242_s29 = scalar_lea.vmem [#allocation8], %s573_s26 }
  0xef   : > { %v233_v15 = vsel %vm938_vm9, %v231_v13, %v232_v10  ;;  %v946_v17 = vld [vmem:[%s236_s28] ss:$0 sm:$0xff] }
  0xf0   : > { %v244_v18 = vld [vmem:[%s242_s29] ss:$0 sm:$0xff]  ;;  %234 = vst [vmem:[#allocation2] sm:$0x1] %v233_v15  ;;  %239 = vst [vmem:[%s236_s28] sm:$0x1] %v237_v11  ;;  %vm247_vm10 = vcmp.ne.f32.partialorder %v946_v17, 0.0 }
  0xf1   : > { %245 = vst [vmem:[%s242_s29] sm:$0x1] %v243_v12  ;;  %240 = vst [vmem:[%s235_s25] sm:$0x1] %v946_v17  ;;  %v254_v51 = vsel %vm253_vm8, %v946_v17, 0.0 }
  0xf2   : > { %246 = vst [vmem:[%s241_s27] sm:$0x1] %v244_v18  ;;  %vm248_vm14 = vmand %vm938_vm9, %vm247_vm10 }
  0xf3   : > { %v249_v20 = vsel %vm248_vm14, %v946_v17, 1.0 }
  0xf4   : > { %v277_v21 = vsel %vm276_vm11, %v249_v20, 1.0  ;;  %v262_v22 = vsel %vm261_vm12, %v249_v20, 1.0  ;;  %v292_v23 = vsel %vm291_vm13, %v249_v20, 1.0  ;;  %v307_v25 = vsel %vm306_vm15, %v249_v20, 1.0 }
  0xf5   : > { %706 = vrcp.f32 %v277_v21  ;;  %v322_v26 = vsel %vm321_vm0, %v249_v20, 1.0  ;;  %v337_v27 = vsel %vm336_vm1, %v249_v20, 1.0 }
  0xf6   : > { %708 = vrcp.f32 %v262_v22 }
  0xf7   : > { %710 = vrcp.f32 %v292_v23  ;;  %v404_v7 = vld [vmem:[#allocation2] sm:$0x1] (%p109_p3) }
  0xf8   : > { %712 = vrcp.f32 %v307_v25  ;;  %v273_v30 = vld [vmem:[#allocation1 + $0x8] sm:$0xff]  ;;  %v258_v33 = vld [vmem:[#allocation1] sm:$0xff]  ;;  %v288_v37 = vld [vmem:[#allocation1 + $0x10] sm:$0xff]  ;;  %406 = vst [vmem:[#allocation3] sm:$0x1] (%p109_p3), %v404_v7 }
  0xf9   : > { %714 = vrcp.f32 %v322_v26  ;;  %v303_v14 = vld [vmem:[#allocation1 + $0x18] sm:$0xff]  ;;  %v318_v45 = vld [vmem:[#allocation1 + $0x20] sm:$0xff]  ;;  %v333_v19 = vld [vmem:[#allocation1 + $0x28] sm:$0xff] }
  0xfa   : > { %716 = vrcp.f32 %v337_v27  ;;  %v347_v3 = vld [vmem:[#allocation8] sm:$0xff] (%p109_p3)  ;;  %v349_v5 = vld [vmem:[#allocation8 + $0x8] sm:$0xff] (%p109_p3)  ;;  %v351_v6 = vld [vmem:[#allocation8 + $0x10] sm:$0xff] (%p109_p3) }
  0xfb   :  { %v353_v8 = vld [vmem:[#allocation8 + $0x18] sm:$0xff] (%p109_p3)  ;;  %v355_v10 = vld [vmem:[#allocation8 + $0x20] sm:$0xff] (%p109_p3)  ;;  %v357_v11 = vld [vmem:[#allocation8 + $0x28] sm:$0xff] (%p109_p3) }
  0xff   : > { %v707_v28 = vpop.eup %706 }
 0x100   : > { %v709_v31 = vpop.eup %708  ;;  %v279_v32 = vmul.f32 %v707_v28, %v273_v30 }
 0x101   : > { %v711_v35 = vpop.eup %710  ;;  %v264_v36 = vmul.f32 %v709_v31, %v258_v33 }
 0x102   : > { %v281_v38 = vsel %vm280_vm2, %v279_v32, 0.0  ;;  %v294_v39 = vmul.f32 %v711_v35, %v288_v37  ;;  %v713_v40 = vpop.eup %712 }
 0x103   : > { %282 = vadd.xlane.f32.xlu1 %v281_v38  ;;  %v266_v41 = vsel %vm265_vm3, %v264_v36, 0.0  ;;  %v309_v43 = vmul.f32 %v713_v40, %v303_v14  ;;  %v715_v44 = vpop.eup %714 }
 0x104   : > { %267 = vadd.xlane.f32.xlu0 %v266_v41  ;;  %v296_v42 = vsel %vm295_vm4, %v294_v39, 0.0  ;;  %v324_v47 = vmul.f32 %v715_v44, %v318_v45  ;;  %v717_v48 = vpop.eup %716 }
 0x105   : > { %v311_v46 = vsel %vm310_vm5, %v309_v43, 0.0  ;;  %v339_v50 = vmul.f32 %v717_v48, %v333_v19 }
 0x106   : > { %v326_v49 = vsel %vm325_vm6, %v324_v47, 0.0 }
 0x107   : > { %297 = vadd.xlane.f32.xlu1 %v296_v42  ;;  %v341_v24 = vsel %vm340_vm7, %v339_v50, 0.0 }
 0x10b   : > { %312 = vadd.xlane.f32.xlu1 %v311_v46 }
 0x10f   : > { %327 = vadd.xlane.f32.xlu1 %v326_v49 }
 0x113   : > { %342 = vadd.xlane.f32.xlu1 %v341_v24 }
 0x131   :  { %368 = vxpose.xlu0.b32.start [1/6] (short) (narrow) (%p109_p3), %v347_v3, 8 }
 0x135   :  { %369 = vxpose.xlu0.b32.cont [2/6] (short) (narrow) (%p109_p3), %v349_v5, 8 }
 0x139   :  { %370 = vxpose.xlu0.b32.cont [3/6] (short) (narrow) (%p109_p3), %v351_v6, 8 }
 0x13d   :  { %371 = vxpose.xlu0.b32.cont [4/6] (short) (narrow) (%p109_p3), %v353_v8, 8 }
 0x141   :  { %372 = vxpose.xlu0.b32.cont [5/6] (short) (narrow) (%p109_p3), %v355_v10, 8 }
 0x145   :  { %373 = vxpose.xlu0.b32.end [6/6] (short) (narrow) (%p109_p3), %v357_v11, 8 }
 0x190   : > { %v283_v52 = vpop.xlane.xlu1 %282 }
 0x191   : > { %v284_v29 = vmul.f32 %v283_v52, %v254_v51  ;;  %v268_v53 = vpop.xlane.xlu0 %267 }
 0x192   : > { %v269_v54 = vmul.f32 %v268_v53, %v254_v51 }
 0x193   : > { %v285_v55 = vsub.f32 %v279_v32, %v284_v29 }
 0x194   : > { %v270_v56 = vsub.f32 %v264_v36, %v269_v54  ;;  %v298_v57 = vpop.xlane.xlu1 %297 }
 0x195   : > { %286 = vst [vmem:[#allocation1 + $0x8] sm:$0xff] %v285_v55  ;;  %v299_v58 = vmul.f32 %v298_v57, %v254_v51 }
 0x196   : > { %271 = vst [vmem:[#allocation1] sm:$0xff] %v270_v56 }
 0x197   : > { %v300_v59 = vsub.f32 %v294_v39, %v299_v58 }
 0x198   : > { %v313_v34 = vpop.xlane.xlu1 %312 }
 0x199   : > { %301 = vst [vmem:[#allocation1 + $0x10] sm:$0xff] %v300_v59  ;;  %v314_v60 = vmul.f32 %v313_v34, %v254_v51 }
 0x19b   : > { %v315_v61 = vsub.f32 %v309_v43, %v314_v60 }
 0x19c   : > { %v328_v62 = vpop.xlane.xlu1 %327 }
 0x19d   : > { %316 = vst [vmem:[#allocation1 + $0x18] sm:$0xff] %v315_v61  ;;  %v329_v16 = vmul.f32 %v328_v62, %v254_v51 }
 0x19f   : > { %v330_v63 = vsub.f32 %v324_v47, %v329_v16 }
 0x1a0   : > { %v343_v0 = vpop.xlane.xlu1 %342  ;;  %111 = sbr.rel (!%p109_p3) target bundleno = 36 (0x24), region = 172 }
 0x1a1   : > { %331 = vst [vmem:[#allocation1 + $0x20] sm:$0xff] %v330_v63  ;;  %v344_v1 = vmul.f32 %v343_v0, %v254_v51 }
 0x1a3   : > { %v345_v2 = vsub.f32 %v339_v50, %v344_v1 }
 0x1a5   : > { %346 = vst [vmem:[#allocation1 + $0x28] sm:$0xff] %v345_v2 }
 0x1b1   :  { %v384_v12 = vpop.trf.xlu0 }
 0x1b2   :  { %400 = vst [vmem:[#allocation5] sm:$0x1] %v384_v12 }
 0x1b9   :  { %v410_v13 = vld [vmem:[#allocation5] sm:$0x1] }
 0x1ba   :  { %412 = vst [vmem:[#allocation6] sm:$0x1] %v410_v13 }
 0x1bb LB: > { %v460_v4 = vld [vmem:[%s852_s6] sm:$0xff]  ;;  %s462_s6 = scalar_lea.vmem %s852_s6, 8   ;;  %s852_s6 = sphi %s850_s6, %s462_s6   ;;  %s848_s5 = sphi %s846_s5, %s463_s5  }
 0x1bc   : > { %461 = vst [vmem:[%s848_s5] sm:$0xff] %v460_v4  ;;  %s463_s5 = scalar_lea.vmem %s848_s5, 8   ;;  %p457_p4 = scmp.gt.s32.totalorder %s462_s6, [#allocation1 + $0x28] }
 0x1bd   :  { %s855_s7 = smov (%p457_p4), [#allocation3]   ;;  %s856_s9 = smov (%p457_p4), [#allocation6]  }
 0x1be   :  { %459 = sbr.rel (!%p457_p4) target bundleno = 443 (0x1bb), region = 194  ;;  %s480_s8 = sshll.u32 (%p457_p4), %s855_s7, 4  ;;  %s481_s8 = int_to_ptr.vmem [resolvable:$true] %s480_s8 }
 0x1bf   :  { %s489_s10 = sshll.u32 (%p457_p4), %s856_s9, 4  ;;  %s718_s1 = scalar_lea.vmem (%p457_p4), %s481_s8, 16  ;;  %s490_s10 = int_to_ptr.vmem [resolvable:$true] %s489_s10 }
 0x1c0   :  { %p719_p5 = scmp.ne.s32.totalorder (%p457_p4), %s481_s8, %s718_s1  ;;  %s722_s11 = scalar_lea.vmem (%p457_p4), %s481_s8, 32 }
 0x1c1   :  { %p723_p6 = scmp.lt.s32.totalorder (%p457_p4), %s481_s8, %s481_s8  ;;  %p724_p7 = scmp.lt.s32.totalorder (%p457_p4), %s722_s11, %s718_s1 }
 0x1c3   :  { %p725_p8 = por (%p457_p4), %p724_p7, %p723_p6 }
 0x1c5   :  { %p726_p9 = pnand %p725_p8, %p719_p5 }
 0x1c7   :  { %729 = shalt.err (!%p726_p9)
}
 0x1c8   :  { %s730_s14 = scalar_lea.hbm %s1048_s2, 16 }
 0x1c9   :  { %p731_p10 = scmp.ne.s32.totalorder %s1048_s2, %s730_s14  ;;  %p734_p11 = scmp.lt.u32.totalorder %s730_s14, %s1048_s2 }
 0x1cb   :  { %p736_p12 = pnand %p734_p11, %p731_p10 }
 0x1cd   :  { %739 = shalt.err (!%p736_p12)
}
 0x1ce   :  { %483 = dma.vmem_to_hbm [thread:$0]  %s481_s8, 16, %s1048_s2, [#allocation4]  }
 0x1cf   :  { %s740_s0 = scalar_lea.vmem %s490_s10, 16  ;;  %s744_s21 = scalar_lea.vmem %s490_s10, 32 }
 0x1d0   :  { %p741_p13 = scmp.ne.s32.totalorder %s490_s10, %s740_s0  ;;  %p745_p0 = scmp.lt.s32.totalorder %s490_s10, %s490_s10 }
 0x1d1   :  { %p746_p1 = scmp.lt.s32.totalorder %s744_s21, %s740_s0 }
 0x1d3   :  { %p747_p2 = por %p746_p1, %p745_p0 }
 0x1d5   :  { %p748_p3 = pnand %p747_p2, %p741_p13 }
 0x1d7   :  { %751 = shalt.err (!%p748_p3)
}
 0x1d8   :  { %s752_s24 = scalar_lea.hbm %s1049_s3, 16 }
 0x1d9   :  { %p753_p4 = scmp.ne.s32.totalorder %s1049_s3, %s752_s24  ;;  %p756_p5 = scmp.lt.u32.totalorder %s752_s24, %s1049_s3 }
 0x1db   :  { %p758_p6 = pnand %p756_p5, %p753_p4 }
 0x1dd   :  { %761 = shalt.err (!%p758_p6)
}
 0x1de   :  { %492 = dma.vmem_to_hbm [thread:$0]  %s490_s10, 16, %s1049_s3, [#allocation7]  }
 0x1df   :  { %826 = dma.done.wait [#allocation4], 16  }
 0x1e0   :  { %827 = vsyncadd [#allocation4], 4294967280 }
 0x1e1   :  { %828 = dma.done.wait [#allocation7], 16  }
 0x1e2   :  { %829 = vsyncadd [#allocation7], 4294967280 }
 0x1e3   :  { %499 = vsyncpa [#allocation4], 1 }
 0x1e4   :  { %500 = vsyncpa [#allocation7], 1 }

// kernel: custom-call.14
= control target key start
LH: loop header
LB: loop body
LE: loop exit
PB: predicated region body
PF: predicated region fallthrough
CT: control target
= control target key end

     0   :  { %5 = vsyncpa [#allocation4], 0  ;;  %s835_s0 = inlined_call_operand.vmem [shape: f32[12,12], index: 0, kind: input, shape index: {}]   ;;  %s836_s1 = inlined_call_operand.vmem [shape: f32[12,12], index: 1, kind: output, shape index: {0}]   ;;  %s837_s2 = inlined_call_operand.hbm [shape: s32[12], index: 2, kind: output, shape index: {1}]   ;;  %s838_s3 = inlined_call_operand.hbm [shape: s32[12], index: 3, kind: output, shape index: {2}]  }
   0x1   :  { %6 = vsyncpa [#allocation7], 0  ;;  %s20_s14 = scalar_lea.vmem %s835_s0, 8 }
   0x2   :  { %p399_p0 = scmp.gt.s32.totalorder %s835_s0, %s20_s14 }
   0x3   :  { %s694_s17 = smov (!%p399_p0), [#allocation0]   ;;  %s698_s20 = smov (!%p399_p0), %s835_s0  }
   0x4   :  { %400 = sbr.rel (%p399_p0) target bundleno = 21 (0x15), region = 128 }
   0xb LB: > { %v54_v0 = vld [vmem:[%s700_s20] sm:$0xff]  ;;  %s56_s20 = scalar_lea.vmem %s700_s20, 8   ;;  %s700_s20 = sphi %s698_s20, %s56_s20   ;;  %s696_s17 = sphi %s694_s17, %s57_s17  }
   0xc   : > { %55 = vst [vmem:[%s696_s17] sm:$0xff] %v54_v0  ;;  %s57_s17 = scalar_lea.vmem %s696_s17, 8   ;;  %p51_p1 = scmp.gt.s32.totalorder %s56_s20, %s20_s14 }
   0xe   :  { %53 = sbr.rel (!%p51_p1) target bundleno = 11 (0xb), region = 134 }
  0x15 PF:  { %v69_v1 = vld [vmem:[#allocation0] sm:$0xff]  ;;  %v73_v2 = vld [vmem:[#allocation0 + $0x8] sm:$0xff]  ;;  %v76_v3 = vlaneseq  ;;  %v718_v4 = vmov 0   ;;  %s702_s0 = smov 0  }
  0x16   :  { %70 = vst [vmem:[#allocation1] sm:$0xff] %v69_v1  ;;  %74 = vst [vmem:[#allocation1 + $0x8] sm:$0xff] %v73_v2 }
  0x17   :  { %75 = vst [vmem:[#allocation2] sm:$0x1] %v718_v4  ;;  %v751_v5 = vshrl.u32 %v76_v3, 7 }
  0x18 LB: > { %s437_s21 = sshll.u32 %s704_s0, 3  ;;  %s84_s0 = sadd.s32 1, %s704_s0   ;;  %s704_s0 = sphi %s702_s0, %s84_s0  }
  0x19   : > { %v88_v6 = vstv %s437_s21  ;;  %s86_s22 = scalar_lea.vmem [#allocation8], %s437_s21  ;;  %p81_p2 = scmp.ge.s32.totalorder %s84_s0, 2  }
  0x1a   : > { %v89_v7 = vadd.s32 %v88_v6, %v751_v5  ;;  %s754_s23 = smov (%p81_p2), 0  }
  0x1b   :  { %83 = sbr.rel (!%p81_p2) target bundleno = 24 (0x18), region = 145 }
  0x1c   : > { %90 = vst [vmem:[%s86_s22] sm:$0xff] %v89_v7 }
  0x22 LB: > { %v101_v8 = vld [vmem:[#allocation1] sm:$0xff]  ;;  %v113_v9 = vld [vmem:[#allocation1 + $0x8] sm:$0xff]  ;;  %v760_v10 = vadd.s32 8, %v751_v5  ;;  %v763_v12 = vstv %s708_s23  ;;  %s159_s24 = ssub.s32 128, %s708_s23  ;;  %v165_v45 = vand.u32 127, %v76_v3  ;;  %s171_s25 = scalar_lea.vmem [#allocation1], %s708_s23  ;;  %s708_s23 = sphi %s754_s23, %s96_s23  }
  0x23   : > { %v102_v11 = vand.u32 2147483647, %v101_v8  ;;  %v114_v13 = vand.u32 2147483647, %v113_v9  ;;  %vm105_vm1 = vcmp.ge.s32.totalorder %v751_v5, %v763_v12  ;;  %v168_v48 = vld [vmem:[#allocation2] ss:$0 sm:$0xff] }
  0x24   : > { %vm118_vm0 = vcmp.lt.s32.totalorder %v760_v10, 12  ;;  %vm117_vm3 = vcmp.ge.s32.totalorder %v760_v10, %v763_v12  ;;  %vm189_vm15 = vcmp.gt.s32.totalorder %v165_v45, %v763_v12  ;;  %v173_v49 = vld [vmem:[%s171_s25] ss:$0 sm:$0xff]  ;;  %s177_s27 = scalar_lea.vmem [#allocation8], %s708_s23  ;;  %s96_s23 = sadd.s32 1, %s708_s23  }
  0x25   : > { %vm439_vm2 = vcmp.gt.f32.partialorder %v102_v11, -inf  ;;  %vm119_vm5 = vmand %vm117_vm3, %vm118_vm0  ;;  %vm212_vm0 = vcmp.gt.s32.totalorder %v760_v10, %v763_v12  ;;  %v179_v50 = vld [vmem:[%s177_s27] ss:$0 sm:$0xff]  ;;  %p93_p3 = scmp.ge.s32.totalorder %s96_s23, 12  }
  0x26   : > { %vm109_vm4 = vmand %vm105_vm1, %vm439_vm2  ;;  %vm166_vm1 = vcmp.eq.s32.totalorder %v165_v45, %v763_v12  ;;  %s710_s5 = smov (%p93_p3), %s836_s1   ;;  %s714_s6 = smov (%p93_p3), [#allocation1]  }
  0x27   : > { %v110_v14 = vsel %vm109_vm4, %v751_v5, %v763_v12  ;;  %v111_v15 = vsel %vm109_vm4, %v102_v11, -inf  ;;  %vm784_vm2 = vmand %vm212_vm0, %vm166_vm1  ;;  %vm197_vm4 = vcmp.gt.s32.totalorder %v751_v5, %v763_v12 }
  0x28   : > { %vm120_vm6 = vcmp.lt.f32.partialorder %v111_v15, %v114_v13 }
  0x29   : > { %vm121_vm7 = vmand %vm119_vm5, %vm120_vm6 }
  0x2a   : > { %v122_v16 = vsel %vm121_vm7, %v760_v10, %v110_v14  ;;  %v123_v17 = vsel %vm121_vm7, %v114_v13, %v111_v15  ;;  %vm201_vm6 = vmand %vm197_vm4, %vm166_vm1 }
  0x2b   : > { %v124_v18 = vrot.slane %v123_v17, 1  ;;  %v125_v19 = vrot.slane %v122_v16, 1 }
  0x2d   : > { %vm126_vm8 = vcmp.ge.f32.partialorder %v124_v18, %v123_v17  ;;  %v129_v20 = vrot.slane %v124_v18, 1  ;;  %v130_v21 = vrot.slane %v125_v19, 1 }
  0x2e   : > { %v127_v22 = vsel %vm126_vm8, %v124_v18, %v123_v17  ;;  %v128_v23 = vsel %vm126_vm8, %v125_v19, %v122_v16 }
  0x2f   : > { %vm131_vm9 = vcmp.ge.f32.partialorder %v129_v20, %v127_v22  ;;  %v134_v24 = vrot.slane %v129_v20, 1  ;;  %v135_v25 = vrot.slane %v130_v21, 1 }
  0x30   : > { %v132_v26 = vsel %vm131_vm9, %v129_v20, %v127_v22  ;;  %v133_v27 = vsel %vm131_vm9, %v130_v21, %v128_v23 }
  0x31   : > { %vm136_vm10 = vcmp.ge.f32.partialorder %v134_v24, %v132_v26  ;;  %v139_v28 = vrot.slane %v134_v24, 1  ;;  %v140_v29 = vrot.slane %v135_v25, 1 }
  0x32   : > { %v137_v30 = vsel %vm136_vm10, %v134_v24, %v132_v26  ;;  %v138_v31 = vsel %vm136_vm10, %v135_v25, %v133_v27 }
  0x33   : > { %vm141_vm11 = vcmp.ge.f32.partialorder %v139_v28, %v137_v30  ;;  %v144_v32 = vrot.slane %v139_v28, 1  ;;  %v145_v33 = vrot.slane %v140_v29, 1 }
  0x34   : > { %v142_v34 = vsel %vm141_vm11, %v139_v28, %v137_v30  ;;  %v143_v35 = vsel %vm141_vm11, %v140_v29, %v138_v31 }
  0x35   : > { %vm146_vm12 = vcmp.ge.f32.partialorder %v144_v32, %v142_v34  ;;  %v149_v36 = vrot.slane %v144_v32, 1  ;;  %v150_v37 = vrot.slane %v145_v33, 1 }
  0x36   : > { %v147_v38 = vsel %vm146_vm12, %v144_v32, %v142_v34  ;;  %v148_v39 = vsel %vm146_vm12, %v145_v33, %v143_v35 }
  0x37   : > { %vm151_vm13 = vcmp.ge.f32.partialorder %v149_v36, %v147_v38  ;;  %v154_v40 = vrot.slane %v149_v36, 1  ;;  %v155_v41 = vrot.slane %v150_v37, 1 }
  0x38   : > { %v152_v42 = vsel %vm151_vm13, %v149_v36, %v147_v38  ;;  %v153_v43 = vsel %vm151_vm13, %v150_v37, %v148_v39 }
  0x39   : > { %vm156_vm14 = vcmp.ge.f32.partialorder %v154_v40, %v152_v42 }
  0x3a   : > { %v158_v44 = vsel %vm156_vm14, %v155_v41, %v153_v43 }
  0x3b   : > { %160 = vrot.lane.b32.xlu0 %v158_v44, %s159_s24 }
  0xad   : > { %v161_v47 = vpop.permute.xlu0 %160 }
  0xae   : > { %444 = vpush %v161_v47 }
  0xdf   : > { %s445_s26 = spop %444 }
  0xe0   : > { %v167_v51 = vstv %s445_s26  ;;  %s172_s28 = scalar_lea.vmem [#allocation1], %s445_s26  ;;  %s178_s29 = scalar_lea.vmem [#allocation8], %s445_s26 }
  0xe1   : > { %v169_v52 = vsel %vm166_vm1, %v167_v51, %v168_v48  ;;  %v174_v53 = vld [vmem:[%s172_s28] ss:$0 sm:$0xff] }
  0xe2   : > { %v180_v54 = vld [vmem:[%s178_s29] ss:$0 sm:$0xff]  ;;  %170 = vst [vmem:[#allocation2] sm:$0x1] %v169_v52  ;;  %175 = vst [vmem:[%s172_s28] sm:$0x1] %v173_v49  ;;  %vm183_vm3 = vcmp.ne.f32.partialorder %v174_v53, 0.0 }
  0xe3   : > { %181 = vst [vmem:[%s178_s29] sm:$0x1] %v179_v50  ;;  %176 = vst [vmem:[%s171_s25] sm:$0x1] %v174_v53  ;;  %v190_v2 = vsel %vm189_vm15, %v174_v53, 0.0 }
  0xe4   : > { %182 = vst [vmem:[%s177_s27] sm:$0x1] %v180_v54  ;;  %vm184_vm5 = vmand %vm166_vm1, %vm183_vm3 }
  0xe5   : > { %v185_v55 = vsel %vm184_vm5, %v174_v53, 1.0 }
  0xe6   : > { %v213_v56 = vsel %vm212_vm0, %v185_v55, 1.0  ;;  %v198_v57 = vsel %vm197_vm4, %v185_v55, 1.0 }
  0xe7   : > { %578 = vrcp.f32 %v213_v56 }
  0xe8   : > { %580 = vrcp.f32 %v198_v57 }
  0xe9   :  { %v276_v12 = vld [vmem:[#allocation2] sm:$0x1] (%p93_p3) }
  0xea   : > { %v209_v59 = vld [vmem:[#allocation1 + $0x8] sm:$0xff]  ;;  %v194_v62 = vld [vmem:[#allocation1] sm:$0xff]  ;;  %278 = vst [vmem:[#allocation3] sm:$0x1] (%p93_p3), %v276_v12 }
  0xeb   :  { %v223_v11 = vld [vmem:[#allocation8] sm:$0xff] (%p93_p3)  ;;  %v225_v13 = vld [vmem:[#allocation8 + $0x8] sm:$0xff] (%p93_p3) }
  0xf1   : > { %v579_v58 = vpop.eup %578 }
  0xf2   : > { %v581_v60 = vpop.eup %580  ;;  %v215_v61 = vmul.f32 %v579_v58, %v209_v59 }
  0xf3   : > { %v200_v63 = vmul.f32 %v581_v60, %v194_v62 }
  0xf4   : > { %v217_v0 = vsel %vm784_vm2, %v215_v61, 0.0 }
  0xf5   : > { %218 = vadd.xlane.f32.xlu1 %v217_v0  ;;  %v202_v1 = vsel %vm201_vm6, %v200_v63, 0.0 }
  0xf6   : > { %203 = vadd.xlane.f32.xlu0 %v202_v1 }
 0x123   :  { %240 = vxpose.xlu0.b32.start [1/2] (short) (narrow) (%p93_p3), %v223_v11, 8 }
 0x127   :  { %241 = vxpose.xlu0.b32.end [2/2] (short) (narrow) (%p93_p3), %v225_v13, 8 }
 0x182   : > { %v219_v4 = vpop.xlane.xlu1 %218  ;;  %95 = sbr.rel (!%p93_p3) target bundleno = 34 (0x22), region = 156 }
 0x183   : > { %v220_v6 = vmul.f32 %v219_v4, %v190_v2  ;;  %v204_v7 = vpop.xlane.xlu0 %203 }
 0x184   : > { %v205_v8 = vmul.f32 %v204_v7, %v190_v2 }
 0x185   : > { %v221_v9 = vsub.f32 %v215_v61, %v220_v6 }
 0x186   : > { %v206_v10 = vsub.f32 %v200_v63, %v205_v8 }
 0x187   : > { %222 = vst [vmem:[#allocation1 + $0x8] sm:$0xff] %v221_v9 }
 0x188   : > { %207 = vst [vmem:[#allocation1] sm:$0xff] %v206_v10 }
 0x1a3   :  { %v256_v14 = vpop.trf.xlu0 }
 0x1a4   :  { %272 = vst [vmem:[#allocation5] sm:$0x1] %v256_v14 }
 0x1ab   :  { %v282_v15 = vld [vmem:[#allocation5] sm:$0x1] }
 0x1ac   :  { %284 = vst [vmem:[#allocation6] sm:$0x1] %v282_v15 }
 0x1ad LB: > { %v332_v16 = vld [vmem:[%s716_s6] sm:$0xff]  ;;  %s334_s6 = scalar_lea.vmem %s716_s6, 8   ;;  %s716_s6 = sphi %s714_s6, %s334_s6   ;;  %s712_s5 = sphi %s710_s5, %s335_s5  }
 0x1ae   : > { %333 = vst [vmem:[%s712_s5] sm:$0xff] %v332_v16  ;;  %s335_s5 = scalar_lea.vmem %s712_s5, 8   ;;  %p329_p4 = scmp.gt.s32.totalorder %s334_s6, [#allocation1 + $0x8] }
 0x1af   :  { %s719_s7 = smov (%p329_p4), [#allocation3]   ;;  %s720_s9 = smov (%p329_p4), [#allocation6]  }
 0x1b0   :  { %331 = sbr.rel (!%p329_p4) target bundleno = 429 (0x1ad), region = 178  ;;  %s352_s8 = sshll.u32 (%p329_p4), %s719_s7, 4  ;;  %s353_s8 = int_to_ptr.vmem [resolvable:$true] %s352_s8 }
 0x1b1   :  { %s361_s10 = sshll.u32 (%p329_p4), %s720_s9, 4  ;;  %s582_s1 = scalar_lea.vmem (%p329_p4), %s353_s8, 16  ;;  %s362_s10 = int_to_ptr.vmem [resolvable:$true] %s361_s10 }
 0x1b2   :  { %p583_p5 = scmp.ne.s32.totalorder (%p329_p4), %s353_s8, %s582_s1  ;;  %s586_s11 = scalar_lea.vmem (%p329_p4), %s353_s8, 32 }
 0x1b3   :  { %p587_p6 = scmp.lt.s32.totalorder (%p329_p4), %s353_s8, %s353_s8  ;;  %p588_p7 = scmp.lt.s32.totalorder (%p329_p4), %s586_s11, %s582_s1 }
 0x1b5   :  { %p589_p8 = por (%p329_p4), %p588_p7, %p587_p6 }
 0x1b7   :  { %p590_p9 = pnand %p589_p8, %p583_p5 }
 0x1b9   :  { %593 = shalt.err (!%p590_p9)
}
 0x1ba   :  { %s594_s14 = scalar_lea.hbm %s837_s2, 16 }
 0x1bb   :  { %p595_p10 = scmp.ne.s32.totalorder %s837_s2, %s594_s14  ;;  %p598_p11 = scmp.lt.u32.totalorder %s594_s14, %s837_s2 }
 0x1bd   :  { %p600_p12 = pnand %p598_p11, %p595_p10 }
 0x1bf   :  { %603 = shalt.err (!%p600_p12)
}
 0x1c0   :  { %355 = dma.vmem_to_hbm [thread:$0]  %s353_s8, 16, %s837_s2, [#allocation4]  }
 0x1c1   :  { %s604_s0 = scalar_lea.vmem %s362_s10, 16  ;;  %s608_s21 = scalar_lea.vmem %s362_s10, 32 }
 0x1c2   :  { %p605_p13 = scmp.ne.s32.totalorder %s362_s10, %s604_s0  ;;  %p609_p0 = scmp.lt.s32.totalorder %s362_s10, %s362_s10 }
 0x1c3   :  { %p610_p1 = scmp.lt.s32.totalorder %s608_s21, %s604_s0 }
 0x1c5   :  { %p611_p2 = por %p610_p1, %p609_p0 }
 0x1c7   :  { %p612_p3 = pnand %p611_p2, %p605_p13 }
 0x1c9   :  { %615 = shalt.err (!%p612_p3)
}
 0x1ca   :  { %s616_s24 = scalar_lea.hbm %s838_s3, 16 }
 0x1cb   :  { %p617_p4 = scmp.ne.s32.totalorder %s838_s3, %s616_s24  ;;  %p620_p5 = scmp.lt.u32.totalorder %s616_s24, %s838_s3 }
 0x1cd   :  { %p622_p6 = pnand %p620_p5, %p617_p4 }
 0x1cf   :  { %625 = shalt.err (!%p622_p6)
}
 0x1d0   :  { %364 = dma.vmem_to_hbm [thread:$0]  %s362_s10, 16, %s838_s3, [#allocation7]  }
 0x1d1   :  { %690 = dma.done.wait [#allocation4], 16  }
 0x1d2   :  { %691 = vsyncadd [#allocation4], 4294967280 }
 0x1d3   :  { %692 = dma.done.wait [#allocation7], 16  }
 0x1d4   :  { %693 = vsyncadd [#allocation7], 4294967280 }
 0x1d5   :  { %371 = vsyncpa [#allocation4], 1 }
 0x1d6   :  { %372 = vsyncpa [#allocation7], 1 }

// kernel: flow_upsampler_encode.3
= control target key start
LH: loop header
LB: loop body
LE: loop exit
PB: predicated region body
PF: predicated region fallthrough
CT: control target
= control target key end

     0   :  { %16 = vsyncpa [#allocation3], 0  ;;  %s1704_s0 = inlined_call_operand.vmem [shape: f32[32,128], index: 0, kind: input, shape index: {}]   ;;  %s1705_s1 = inlined_call_operand.vmem [shape: bf16[32,64], index: 1, kind: input, shape index: {}]   ;;  %s1706_s2 = inlined_call_operand.vmem [shape: f32[1,128,128], index: 2, kind: input, shape index: {}]   ;;  %s1707_s3 = inlined_call_operand.vmem [shape: f32[1,1,128], index: 3, kind: input, shape index: {}]   ;;  %s1708_s4 = inlined_call_operand.vmem [shape: bf16[1,128,128], index: 4, kind: input, shape index: {}]   ;;  %s1709_s5 = inlined_call_operand.vmem [shape: bf16[64,128], index: 5, kind: input, shape index: {}]   ;;  %s1710_s6 = inlined_call_operand.vmem [shape: f32[1,1,128], index: 6, kind: input, shape index: {}]   ;;  %s1711_s7 = inlined_call_operand.vmem [shape: bf16[1,128,256], index: 7, kind: input, shape index: {}]   ;;  %s1712_s8 = inlined_call_operand.vmem [shape: f32[1,1,256], index: 8, kind: input, shape index: {}]   ;;  %s1713_s9 = inlined_call_operand.hbm [shape: f32[32,128], index: 9, kind: output, shape index: {0}]   ;;  %s1714_s10 = inlined_call_operand.vmem [shape: f32[2,1,128], index: 10, kind: output, shape index: {1}]  }
   0x1   :  { %18 = vsyncpa [#allocation3 + $0x1], 0  ;;  %s1417_s13 = smov 0   ;;  %s1419_s14 = smov 0  }
   0x2   :  { %s1421_s15 = smov 0   ;;  %s1423_s16 = smov 0  }
   0x3 LB: > { %1716 = sst [smem:[#allocation5_spill]] %s1350_s15  ;;  %s1438_s17 = sadd.s32 4294967295, %s1354_s16   ;;  %s1354_s16 = sphi %s1423_s16, %s1726_s16   ;;  %s1350_s15 = sphi %s1421_s15, %s1723_s15   ;;  %s1346_s14 = sphi %s1419_s14, %s1725_s14   ;;  %s1342_s13 = sphi %s1417_s13, %s1724_s13  }
   0x4   : > { %s1021_s18 = sadd.s32 4294967294, %s1354_s16   ;;  %s1442_s19 = sadd.s32 1, %s1354_s16  }
   0x5   : > { %s230_s20 = sadd.s32 1, %s1350_s15  ;;  %s227_s21 = ssub.s32 %s1354_s16, %s1442_s19 }
   0x6   : > { %p240_p0 = scmp.ne.s32.totalorder %s1350_s15, %s1346_s14  ;;  %p228_p1 = scmp.eq.s32.totalorder %s227_s21, 0 }
   0x7   : > { %p241_p2 = scmp.eq.s32.totalorder %s1438_s17, 1  ;;  %p246_p3 = scmp.ne.s32.totalorder %s1346_s14, %s1342_s13 }
   0x8   : > { %p247_p4 = scmp.eq.s32.totalorder %s1021_s18, 1  ;;  %p1024_p7 = scmp.ge.s32.totalorder %s1354_s16, 1 }
   0x9   : > { %s1453_s22 = scalar_select %p228_p1, %s1350_s15, %s230_s20  }
   0xa   : > { %p1455_p5 = por %p241_p2, %p240_p0  ;;  %p1459_p6 = por %p247_p4, %p246_p3 }
   0xb   : > { %1717 = sst [smem:[#allocation6_spill]] %s1453_s22  ;;  %p330_p8 = scmp.lt.s32.totalorder %s1354_s16, 3 }
   0xd   : > { %p331_p9 = pnand %p1024_p7, %p330_p8 }
   0xe   : > { %v1243_v0 = vld [vmem:[%s1709_s5] sm:$0xff] (!%p331_p9)   ;;  %v1356_v1 = vmov (!%p331_p9), 0.0   ;;  %v1244_v2 = vld [vmem:[%s1709_s5 + $0x8] sm:$0xff] (!%p331_p9)   ;;  %vm1357_vm0 = vmmov (!%p331_p9), 0   ;;  %s1026_s29 = sshll.u32 (!%p331_p9), %s1438_s17, 1  ;;  %v1245_v3 = vld [vmem:[%s1709_s5 + $0x10] sm:$0xff] (!%p331_p9)  }
   0xf   : > { %334 = sbr.rel (%p331_p9) target bundleno = 566 (0x236), region = 56  ;;  %1100 = vmatprep.subr.bf16.mxu0 (!%p331_p9), %v1356_v1  ;;  %1108 = vmatprep.mubr.msk.bf16.mxu0 (!%p331_p9), %vm1357_vm0, %v1356_v1  ;;  %p377_p10 = scmp.lt.s32.totalorder (!%p331_p9), %s1026_s29, 3  ;;  %v1246_v4 = vld [vmem:[%s1709_s5 + $0x18] sm:$0xff] (!%p331_p9)   ;;  %v1248_v5 = vld [vmem:[%s1708_s4] sm:$0xff] (!%p331_p9)   ;;  %vm434_vm1 = vcmask (!%p331_p9), 523264   ;;  %v485_v9 = vld [vmem:[%s1706_s2 + $0x8] sm:$0xff] (!%p331_p9) }
  0x10   : > { %1101 = vmatpush3.bf16.msra.mxu0 (!%p331_p9), %v1243_v0  ;;  %v484_v8 = vld [vmem:[%s1706_s2] sm:$0xff] (!%p331_p9)  ;;  %v486_v10 = vld [vmem:[%s1706_s2 + $0x10] sm:$0xff] (!%p331_p9)  ;;  %v487_v11 = vld [vmem:[%s1706_s2 + $0x18] sm:$0xff] (!%p331_p9)  ;;  %v1358_v57 = vmov (!%p331_p9), 0   ;;  %s1067_s30 = sshll.u32 (!%p331_p9), %s1438_s17, 8  ;;  %s1359_s26 = smov (!%p331_p9), [#allocation2]  }
  0x11   : > { %1102 = vmatprep.subr.bf16.mxu0 (!%p331_p9), %v1356_v1  ;;  %v1167_v12 = vpack.c.bf16 (!%p331_p9), %v485_v9, %v484_v8  ;;  %v1249_v13 = vld [vmem:[%s1708_s4 + $0x8] sm:$0xff] (!%p331_p9)   ;;  %v1171_v14 = vpack.c.bf16 (!%p331_p9), %v487_v11, %v486_v10  ;;  %v488_v15 = vld [vmem:[%s1706_s2 + $0x20] sm:$0xff] (!%p331_p9)  ;;  %v490_v17 = vld [vmem:[%s1706_s2 + $0x30] sm:$0xff] (!%p331_p9)  ;;  %s1648_s20 = scalar_lea.hbm (!%p331_p9), %s1713_s9, %s1067_s30  ;;  %s1296_s27 = sshll.u32 (!%p331_p9), %s1359_s26, 4  ;;  %s1297_s27 = int_to_ptr.vmem [resolvable:$false] %s1296_s27 }
  0x12   : > { %v489_v16 = vld [vmem:[%s1706_s2 + $0x28] sm:$0xff] (!%p331_p9)  ;;  %v491_v18 = vld [vmem:[%s1706_s2 + $0x38] sm:$0xff] (!%p331_p9)  ;;  %v1250_v19 = vld [vmem:[%s1708_s4 + $0x10] sm:$0xff] (!%p331_p9)  }
  0x13   : > { %1168 = vmatprep.subr.bf16.mxu1 (!%p331_p9), %v1167_v12  ;;  %v1175_v20 = vpack.c.bf16 (!%p331_p9), %v489_v16, %v488_v15  ;;  %v1179_v21 = vpack.c.bf16 (!%p331_p9), %v491_v18, %v490_v17  ;;  %v492_v22 = vld [vmem:[%s1706_s2 + $0x40] sm:$0xff] (!%p331_p9)  ;;  %v493_v23 = vld [vmem:[%s1706_s2 + $0x48] sm:$0xff] (!%p331_p9)  ;;  %v1251_v24 = vld [vmem:[%s1708_s4 + $0x18] sm:$0xff] (!%p331_p9)  }
  0x14   : > { %1103 = vmatpush3.bf16.msra.mxu0 (!%p331_p9), %v1244_v2  ;;  %1170 = vmatpush3.bf16.msra.mxu1 (!%p331_p9), %v1167_v12  ;;  %v1183_v25 = vpack.c.bf16 (!%p331_p9), %v493_v23, %v492_v22  ;;  %v494_v26 = vld [vmem:[%s1706_s2 + $0x50] sm:$0xff] (!%p331_p9)  ;;  %v495_v27 = vld [vmem:[%s1706_s2 + $0x58] sm:$0xff] (!%p331_p9)  ;;  %v1252_v28 = vld [vmem:[%s1708_s4 + $0x20] sm:$0xff] (!%p331_p9)   ;;  %v479_v12 = vlaneseq (!%p331_p9) }
  0x15   : > { %1104 = vmatprep.subr.bf16.mxu0 (!%p331_p9), %v1356_v1  ;;  %1172 = vmatprep.subr.bf16.mxu1 (!%p331_p9), %v1171_v14  ;;  %v1187_v29 = vpack.c.bf16 (!%p331_p9), %v495_v27, %v494_v26  ;;  %v1253_v30 = vld [vmem:[%s1708_s4 + $0x28] sm:$0xff] (!%p331_p9)   ;;  %v1254_v31 = vld [vmem:[%s1708_s4 + $0x30] sm:$0xff] (!%p331_p9)   ;;  %v1255_v32 = vld [vmem:[%s1708_s4 + $0x38] sm:$0xff] (!%p331_p9)  }
  0x16   : > { %s1728_s29 = smov (!%p377_p10, %s1026_s29), 3  ;;  %v496_v35 = vld [vmem:[%s1706_s2 + $0x60] sm:$0xff]  ;;  %v497_v36 = vld [vmem:[%s1706_s2 + $0x68] sm:$0xff]  ;;  %v498_v38 = vld [vmem:[%s1706_s2 + $0x70] sm:$0xff] }
  0x17   : > { %s1029_s12 = sshll.u32 %s1728_s29, 2  ;;  %s1027_s25 = sshll.u32 %s1728_s29, 3  ;;  %v1191_v37 = vpack.c.bf16 %v497_v36, %v496_v35  ;;  %v499_v39 = vld [vmem:[%s1706_s2 + $0x78] sm:$0xff]  ;;  %v1258_v41 = vld [vmem:[%s1711_s7 + $0x4] ss:$8 sps:$4 sm:$0xff]  }
  0x18   : > { %s386_s21 = scalar_lea.vmem %s1705_s1, %s1029_s12  ;;  %1105 = vmatpush3.bf16.msra.mxu0 %v1245_v3  ;;  %s1489_s15 = scalar_lea.vmem %s1704_s0, %s1027_s25  ;;  %1174 = vmatpush3.bf16.msra.mxu1 %v1171_v14  ;;  %v1195_v40 = vpack.c.bf16 %v499_v39, %v498_v38  ;;  %v1256_v42 = vld [vmem:[%s1711_s7] ss:$8 sps:$4 sm:$0xff]   ;;  %v1261_v43 = vld [vmem:[%s1711_s7 + $0x14] ss:$8 sps:$4 sm:$0xff]   ;;  %v1259_v44 = vld [vmem:[%s1711_s7 + $0x10] ss:$8 sps:$4 sm:$0xff]  }
  0x19   : > { %1106 = vmatprep.subr.bf16.mxu0 %v1356_v1  ;;  %v1247_v6 = vld [vmem:[%s386_s21] sm:$0xff]   ;;  %1176 = vmatprep.subr.bf16.mxu1 %v1175_v20  ;;  %v394_v33 = vld [vmem:[%s1489_s15 + $0x8] sm:$0xff]  ;;  %v1267_v47 = vld [vmem:[%s1711_s7 + $0x34] ss:$8 sps:$4 sm:$0xff]   ;;  %s368_s21 = sand.u32 1, %s1346_s14  }
  0x1a   : > { %v393_v7 = vld [vmem:[%s1489_s15] sm:$0xff]  ;;  %v1265_v48 = vld [vmem:[%s1711_s7 + $0x30] ss:$8 sps:$4 sm:$0xff]   ;;  %v1273_v51 = vld [vmem:[%s1711_s7 + $0x54] ss:$8 sps:$4 sm:$0xff]   ;;  %s1025_s28 = sshll.u32 %s368_s21, 4 }
  0x1b   : > { %1144 = vmatprep.mubr.f32.mxu1 %v393_v7  ;;  %v582_v34 = vpack.c.bf16 %v394_v33, %v393_v7  ;;  %v1264_v45 = vld [vmem:[%s1711_s7 + $0x24] ss:$8 sps:$4 sm:$0xff]   ;;  %v1262_v46 = vld [vmem:[%s1711_s7 + $0x20] ss:$8 sps:$4 sm:$0xff]   ;;  %v1271_v52 = vld [vmem:[%s1711_s7 + $0x50] ss:$8 sps:$4 sm:$0xff]  }
  0x1c   : > { %1107 = vmatpush3.bf16.msra.mxu0 %v1246_v4  ;;  %1178 = vmatpush3.bf16.msra.mxu1 %v1175_v20  ;;  %v1270_v49 = vld [vmem:[%s1711_s7 + $0x44] ss:$8 sps:$4 sm:$0xff]   ;;  %v1268_v50 = vld [vmem:[%s1711_s7 + $0x40] ss:$8 sps:$4 sm:$0xff]   ;;  %v1279_v55 = vld [vmem:[%s1711_s7 + $0x74] ss:$8 sps:$4 sm:$0xff]  }
  0x1d   : > { %1147 = vmatprep.subr.bf16.mxu0 %v1356_v1  ;;  %1180 = vmatprep.subr.bf16.mxu1 %v1179_v21  ;;  %v1276_v53 = vld [vmem:[%s1711_s7 + $0x64] ss:$8 sps:$4 sm:$0xff]   ;;  %v1274_v54 = vld [vmem:[%s1711_s7 + $0x60] ss:$8 sps:$4 sm:$0xff]   ;;  %v1277_v56 = vld [vmem:[%s1711_s7 + $0x70] ss:$8 sps:$4 sm:$0xff]  }
  0x1e   : > { %v1045_v63 = vld [vmem:[%s1710_s6] ss:$0 sm:$0xff]  ;;  %s370_s11 = scalar_lea.vmem [#allocation2], %s1025_s28  ;;  %s1658_s22 = scalar_lea.sflag [#allocation3], %s368_s21 }
  0x1f   : > { %1109 = vmatmul.mubr.msk.bf16.vlgmr.msra.gmra.mrb[0].mxu0 %vm434_vm1, %v1247_v6  ;;  %v716_v15 = vld [vmem:[%s1712_s8] sm:$0x3]  ;;  %s925_s29 = sshll.u32 %s370_s11, 4  ;;  %s1298_s15 = scalar_lea.vmem %s1297_s27, 512  ;;  %s1650_s29 = int_to_ptr.vmem [resolvable:$true] %s925_s29 }
  0x20   : > { %1148 = vmatpush3.bf16.msra.mxu0 %v1248_v5  ;;  %1163 = vmatprep.mubr.msk.bf16.mxu0 %vm1357_vm0, %v1356_v1  ;;  %v1036_v18 = vld [vmem:[%s1707_s3] ss:$0 sm:$0xff]  ;;  %s1292_s25 = scalar_lea.vmem %s1650_s29, 256  ;;  %p1299_p0 = scmp.lt.s32.totalorder %s1650_s29, %s1297_s27 }
  0x21   : > { %1149 = vmatprep.subr.bf16.mxu0 %v1356_v1  ;;  %1182 = vmatpush3.bf16.msra.mxu1 %v1179_v21  ;;  %p1293_p11 = scmp.ne.s32.totalorder %s1650_s29, %s1292_s25  ;;  %p1300_p1 = scmp.lt.s32.totalorder %s1298_s15, %s1292_s25 }
  0x22   : > { %1184 = vmatprep.subr.bf16.mxu1 %v1183_v25 }
  0x23   : > { %p1294_p12 = pnand %p1293_p11, %p1455_p5  ;;  %p1301_p2 = por %p1300_p1, %p1299_p0 }
  0x24   : > { %1150 = vmatpush3.bf16.msra.mxu0 %v1249_v13  ;;  %v719_v13 = vshrl.u32 %v479_v12, 7 }
  0x25   : > { %1151 = vmatprep.subr.bf16.mxu0 %v1356_v1  ;;  %1186 = vmatpush3.bf16.msra.mxu1 %v1183_v25  ;;  %p1295_p13 = pneg %p1294_p12 }
  0x26   : > { %1188 = vmatprep.subr.bf16.mxu1 %v1187_v29  ;;  %v720_v14 = vsub.s32 0, %v719_v13  ;;  %v724_v16 = vsub.s32 1, %v719_v13 }
  0x27   : > { %p1302_p3 = pnand %p1301_p2, %p1295_p13 }
  0x28   : > { %1152 = vmatpush3.bf16.msra.mxu0 %v1250_v19  ;;  %v721_v17 = vrot.slane %v716_v15, %v720_v14  ;;  %v725_v19 = vrot.slane %v716_v15, %v724_v16 }
  0x29   : > { %1153 = vmatprep.subr.bf16.mxu0 %v1356_v1  ;;  %1190 = vmatpush3.bf16.msra.mxu1 %v1187_v29 }
  0x2a   : > { %1192 = vmatprep.subr.bf16.mxu1 %v1191_v37 }
  0x2c   : > { %1154 = vmatpush3.bf16.msra.mxu0 %v1251_v24 }
  0x2d   : > { %1155 = vmatprep.subr.bf16.mxu0 %v1356_v1  ;;  %1194 = vmatpush3.bf16.msra.mxu1 %v1191_v37 }
  0x2e   : > { %1196 = vmatprep.subr.bf16.mxu1 %v1195_v40 }
  0x30   : > { %1156 = vmatpush3.bf16.msra.mxu0 %v1252_v28 }
  0x31   : > { %1157 = vmatprep.subr.bf16.mxu0 %v1356_v1  ;;  %1198 = vmatpush3.bf16.msra.mxu1 %v1195_v40 }
  0x32   : > { %808 = vmatprep.subr.bf16.mxu1 %v1258_v41 }
  0x34   : > { %1158 = vmatpush3.bf16.msra.mxu0 %v1253_v30  ;;  %1145 = vmatmul.mubr.f32.vlgmr.msra.gmra.mrb[0].mxu1 %v394_v33 }
  0x35   : > { %1159 = vmatprep.subr.bf16.mxu0 %v1356_v1  ;;  %809 = vmatpush1.bf16.msra.mxu1 %v1256_v42 }
  0x36   : > { %810 = vmatprep.subr.bf16.mxu1 %v1261_v43  ;;  %840 = vmatprep.mubr.bf16.mxu1 %v1358_v57 }
  0x38   : > { %1160 = vmatpush3.bf16.msra.mxu0 %v1254_v31 }
  0x39   : > { %1161 = vmatprep.subr.bf16.mxu0 %v1356_v1  ;;  %811 = vmatpush1.bf16.msra.mxu1 %v1259_v44 }
  0x3a   : > { %812 = vmatprep.subr.bf16.mxu1 %v1264_v45  ;;  %v480_v45 = vand.u32 127, %v479_v12 }
  0x3c   : > { %1162 = vmatpush3.bf16.msra.mxu0 %v1255_v32  ;;  %vm481_vm2 = vcmp.ge.s32.totalorder %v480_v45, 24  ;;  %vm482_vm3 = vcmp.lt.s32.totalorder %v480_v45, 48 }
  0x3d   : > { %813 = vmatpush1.bf16.msra.mxu1 %v1262_v46  ;;  %vm1636_vm5 = vmand %vm481_vm2, %vm482_vm3 }
  0x3e   : > { %814 = vmatprep.subr.bf16.mxu1 %v1267_v47 }
  0x3f   : > { %1164 = vmatmul.mubr.bf16.vlgmr.msra.gmra.mrb[4].mxu0 %v582_v34 }
  0x41   : > { %815 = vmatpush1.bf16.msra.mxu1 %v1265_v48 }
  0x42   : > { %816 = vmatprep.subr.bf16.mxu1 %v1270_v49 }
  0x45   : > { %817 = vmatpush1.bf16.msra.mxu1 %v1268_v50 }
  0x46   : > { %818 = vmatprep.subr.bf16.mxu1 %v1273_v51 }
  0x49   : > { %819 = vmatpush1.bf16.msra.mxu1 %v1271_v52 }
  0x4a   : > { %820 = vmatprep.subr.bf16.mxu1 %v1276_v53 }
  0x4d   : > { %821 = vmatpush1.bf16.msra.mxu1 %v1274_v54 }
  0x4e   : > { %822 = vmatprep.subr.bf16.mxu1 %v1279_v55 }
  0x51   : > { %823 = vmatpush1.bf16.msra.mxu1 %v1277_v56 }
  0xf2   : > { %v472_v58 = vpop.f32.mrb[0].mxu0 }
  0xf3   : > { %v1110_v59 = vpop.f32.mrb[1].mxu0 }
  0xf4   : > { %v475_v60 = vpop.f32.mrb[2].mxu0 }
  0xf5   : > { %v1111_v61 = vpop.f32.mrb[3].mxu0 }
 0x107   : > { %v1146_v10 = vpop.f32.mrb[0].mxu1 }
 0x108   : > { %v573_v11 = vpop.f32.mrb[1].mxu1  ;;  %v579_v26 = vadd.f32 %v1146_v10, %v1036_v18 }
 0x109   : > { %v574_v21 = vadd.f32 %v1036_v18, %v573_v11 }
 0x112   : > { %v681_v62 = vpop.f32.mrb[4].mxu0 }
 0x113   : > { %v682_v0 = vadd.f32 %v681_v62, %v472_v58  ;;  %v1165_v1 = vpop.f32.mrb[5].mxu0 }
 0x114   : > { %v684_v2 = vpop.f32.mrb[6].mxu0 }
 0x115   : > { %v695_v3 = vadd.f32 %v1045_v63, %v682_v0  ;;  %v685_v4 = vadd.f32 %v684_v2, %v475_v60  ;;  %v1166_v5 = vpop.f32.mrb[7].mxu0 }
 0x117   : > { %v696_v6 = vadd.f32 %v1045_v63, %v685_v4  ;;  %v697_v7 = vmax.f32 %v695_v3, 0.0 }
 0x119   : > { %v698_v8 = vmax.f32 %v696_v6, 0.0 }
 0x11b   : > { %v699_v9 = vpack.c.bf16 %v698_v8, %v697_v7 }
 0x11d   : > { %841 = vmatmul.mubr.bf16.vlgmr.msra.gmra.mrb[4].mxu1 %v699_v9 }
 0x1f0   : > { %v842_v20 = vpop.f32.mrb[4].mxu1 }
 0x1f1   : > { %v843_v22 = vadd.f32 %v842_v20, %v721_v17  ;;  %v844_v23 = vpop.f32.mrb[5].mxu1 }
 0x1f2   : > { %v845_v24 = vadd.f32 %v844_v23, %v725_v19  ;;  %v846_v25 = vpop.f32.mrb[6].mxu1 }
 0x1f3   : > { %v893_v27 = vadd.f32 %v843_v22, %v574_v21  ;;  %v847_v28 = vadd.f32 %v846_v25, %v721_v17  ;;  %v848_v29 = vpop.f32.mrb[7].mxu1 }
 0x1f4   : > { %v851_v30 = vadd.f32 2.0, %v845_v24  ;;  %v849_v31 = vadd.f32 %v848_v29, %v725_v19 }
 0x1f5   : > { %v894_v32 = vadd.f32 %v847_v28, %v579_v26 }
 0x1f6   : > { %v853_v33 = vand.u32 2147483647, %v851_v30  ;;  %v852_v34 = vadd.f32 2.0, %v849_v31  ;;  %vm883_vm4 = vcmp.ge.f32.partialorder %v851_v30, 0.0  ;;  %v877_v58 = vmin.f32 %v851_v30, 0.0 }
 0x1f8   : > { %v855_v35 = vsub.f32 0.0, %v853_v33  ;;  %v854_v36 = vand.u32 2147483647, %v852_v34  ;;  %v878_v59 = vmin.f32 %v852_v34, 0.0  ;;  %vm884_vm7 = vcmp.ge.f32.partialorder %v852_v34, 0.0 }
 0x1fa   : > { %v857_v37 = vmul.f32 1.442695, %v855_v35  ;;  %v856_v38 = vsub.f32 0.0, %v854_v36 }
 0x1fc   : > { %1280 = vpow2.f32 %v857_v37  ;;  %v859_v39 = vmul.f32 1.442695, %v856_v38 }
 0x1fe   : > { %1282 = vpow2.f32 %v859_v39 }
 0x206   : > { %v1281_v40 = vpop.eup %1280 }
 0x207   : > { %v869_v41 = vadd.f32 1.0, %v1281_v40  ;;  %v863_v44 = vmul.f32 0.5, %v1281_v40  ;;  %v885_v54 = vsel %vm883_vm4, 1.0, %v1281_v40  ;;  %vm861_vm6 = vcmp.lt.f32.partialorder %v1281_v40, 0.0001 }
 0x208   : > { %v1283_v42 = vpop.eup %1282 }
 0x209   : > { %1284 = vlog2.f32 %v869_v41  ;;  %v870_v43 = vadd.f32 1.0, %v1283_v42  ;;  %v864_v46 = vmul.f32 0.5, %v1283_v42  ;;  %v865_v47 = vsub.f32 1.0, %v863_v44 }
 0x20a   : > { %1286 = vrcp.f32 %v869_v41  ;;  %v886_v0 = vsel %vm884_vm7, 1.0, %v1283_v42  ;;  %vm862_vm8 = vcmp.lt.f32.partialorder %v1283_v42, 0.0001 }
 0x20b   : > { %1288 = vlog2.f32 %v870_v43  ;;  %v866_v49 = vsub.f32 1.0, %v864_v46  ;;  %v867_v52 = vmul.f32 %v1281_v40, %v865_v47 }
 0x20c   : > { %1290 = vrcp.f32 %v870_v43 }
 0x20d   : > { %v868_v62 = vmul.f32 %v1283_v42, %v866_v49 }
 0x213   : > { %v1285_v48 = vpop.eup %1284 }
 0x214   : > { %v1287_v50 = vpop.eup %1286  ;;  %v872_v53 = vmul.f32 0.6931472, %v1285_v48 }
 0x215   : > { %v889_v55 = vmul.f32 %v1287_v50, %v885_v54  ;;  %v1289_v56 = vpop.eup %1288 }
 0x216   : > { %v875_v57 = vsel %vm861_vm6, %v867_v52, %v872_v53  ;;  %v1291_v60 = vpop.eup %1290  ;;  %v874_v63 = vmul.f32 0.6931472, %v1289_v56 }
 0x217   : > { %v891_v61 = vsel %vm1636_vm5, %v889_v55, 1.0  ;;  %v879_v1 = vsub.f32 %v877_v58, %v875_v57  ;;  %v890_v3 = vmul.f32 %v1291_v60, %v886_v0 }
 0x218   : > { %v895_v2 = vmul.f32 %v893_v27, %v891_v61  ;;  %v876_v4 = vsel %vm862_vm8, %v868_v62, %v874_v63 }
 0x219   : > { %v880_v5 = vsub.f32 %v878_v59, %v876_v4  ;;  %v892_v6 = vsel %vm1636_vm5, %v890_v3, 1.0  ;;  %v881_v8 = vsel %vm1636_vm5, %v879_v1, 0.0 }
 0x21a   : > { %905 = vst [vmem:[%s370_s11] sm:$0xff] %v895_v2  ;;  %v896_v7 = vmul.f32 %v894_v32, %v892_v6 }
 0x21b   : > { %v882_v9 = vsel %vm1636_vm5, %v880_v5, 0.0 }
 0x21c   : > { %v897_v10 = vadd.f32 %v882_v9, %v881_v8  ;;  %906 = vst [vmem:[%s370_s11 + $0x8] sm:$0xff] %v896_v7 }
 0x21d   : > { %1305 = shalt.err (!%p1302_p3)
}
 0x21e   : > { %s1306_s21 = scalar_lea.hbm %s1648_s20, 256  ;;  %s1310_s11 = scalar_lea.hbm %s1713_s9, 512 }
 0x21f   : > { %p1307_p4 = scmp.ne.s32.totalorder %s1648_s20, %s1306_s21  ;;  %p1311_p9 = scmp.lt.u32.totalorder %s1648_s20, %s1713_s9 }
 0x220   : > { %p1312_p10 = scmp.lt.u32.totalorder %s1310_s11, %s1306_s21  ;;  %p1314_p12 = scmp.lt.u32.totalorder %s1306_s21, %s1648_s20 }
 0x221   : > { %p1308_p7 = pnand %p1307_p4, %p1455_p5 }
 0x222   : > { %p1313_p11 = por %p1312_p10, %p1311_p9 }
 0x223   : > { %p1309_p8 = pneg %p1308_p7 }
 0x224   : > { %p1315_p13 = por %p1314_p12, %p1313_p11 }
 0x226   : > { %p1316_p0 = pnand %p1315_p13, %p1309_p8 }
 0x228   : > { %1319 = shalt.err (!%p1316_p0)
}
 0x229   : > { %s1360_s25 = smov 128   ;;  %s1361_s26 = smov 8   ;;  %v898_v11 = vrot.slane %v897_v10, 4 }
 0x22a   : > { %1199 = dma.vmem_to_hbm [thread:$0]  (%p1455_p5), %s1650_s29, 256, %s1648_s20, %s1658_s22, %s1360_s25, %s1360_s25, %s1361_s26  }
 0x22b   : > { %p389_p1 = scmp.lt.s32.totalorder %s1438_s17, 1  ;;  %v899_v12 = vadd.f32 %v898_v11, %v897_v10 }
 0x22d   : > { %v900_v13 = vrot.slane %v899_v12, 2  ;;  %s1730_s17 = smov (!%p389_p1, %s1438_s17), 1 }
 0x22e   : > { %s391_s21 = scalar_lea.vmem %s1714_s10, %s1730_s17 }
 0x22f   : > { %v901_v14 = vadd.f32 %v900_v13, %v899_v12 }
 0x231   : > { %v902_v15 = vrot.slane %v901_v14, 1 }
 0x233   : > { %v903_v16 = vadd.f32 %v902_v15, %v901_v14 }
 0x235   : > { %907 = vst [vmem:[%s391_s21] sm:$0x1] %v903_v16 }
 0x236 PF: > { %p1205_p2 = scmp.ge.s32.totalorder %s1354_s16, 2  ;;  %s943_s23 = sand.u32 1, %s1342_s13  }
 0x237   : > { %s944_s29 = scalar_lea.sflag [#allocation3], %s943_s23 }
 0x238   : > { %p1202_p5 = pnand %p1205_p2, %p1459_p6 }
 0x23a   : > { %1337 = dma.done.wait (!%p1202_p5), %s944_s29, 256  }
 0x23b   : > { %1339 = vsyncadd (!%p1202_p5), %s944_s29, 4294967040  ;;  %s1722_s20 = sld [smem:[#allocation5_spill]]  ;;  %s1723_s15 = sld [smem:[#allocation6_spill]] }
 0x23c   : > { %p21_p3 = scmp.ge.s32.totalorder %s1442_s19, 4   ;;  %s1724_s13 = smov %s1346_s14 }
 0x23d   : > { %s1726_s16 = smov %s1442_s19 }
 0x23e   :  { %23 = sbr.rel (!%p21_p3) target bundleno = 3 (0x3), region = 106 }
 0x241   : > { %s1725_s14 = smov %s1722_s20 }
 0x245   :  { %955 = vsyncpa [#allocation3], 1 }
 0x246   :  { %957 = vsyncpa [#allocation3 + $0x1], 1 }

</bundles_post_ra>
